<compile_context>
chip_gen: v6e
topology: v6e:2x2x1
jax: 0.10.0
libtpu: 0.0.40
codegen_flags: <defaults>
</compile_context>

<pallas_src>
import functools

import jax
import jax.numpy as jnp
from jax.experimental import pallas as pl
from jax.experimental.pallas import tpu as pltpu


def _round_up(x, m):
    return (x + m - 1) // m * m


# ---------------------------------------------------------------------------
# Prologue kernel:  R = [ X @ Wg | T | 1 | 0-pad ]   (row-tiled, bf16 output)
# ---------------------------------------------------------------------------
def _support_kernel(x_ref, t_ref, wg_ref, r_ref, *, hidden):
    f32 = jnp.float32
    bf16 = jnp.bfloat16
    s = jnp.dot(x_ref[...], wg_ref[...], preferred_element_type=f32)
    t = t_ref[...]
    r_ref[...] = jnp.zeros_like(r_ref)                    # zero the lane padding
    r_ref[:, 0:hidden] = s.astype(bf16)
    r_ref[:, hidden:hidden + 1] = t.astype(bf16)
    r_ref[:, hidden + 1:hidden + 2] = jnp.ones_like(t).astype(bf16)


# ---------------------------------------------------------------------------
# Main kernel: stream A (bf16) and R (bf16), accumulate A @ R over the k grid
# axis in an f32 scratch, then finalize the GCN activation + the three fused
# MLP heads on the last k step.
# ---------------------------------------------------------------------------
def _netest_kernel(a_ref, r_ref, t_ref,
                   bg_ref, w1_ref, ct_ref, cn_ref, b1_ref,
                   w2_ref, b2_ref, w3_ref, b3_ref,
                   out_ref, acc_ref, *, hidden):
    f32 = jnp.float32
    H = hidden
    k = pl.program_id(1)
    nk = pl.num_programs(1)

    @pl.when(k == 0)
    def _init():
        acc_ref[...] = jnp.zeros_like(acc_ref)

    # One fused, native-bf16 MXU pass over the A tile:  A @ [support | T | 1].
    acc_ref[...] += jnp.dot(a_ref[...], r_ref[...], preferred_element_type=f32)

    @pl.when(k == nk - 1)
    def _finalize():
        acc = acc_ref[...]
        t = t_ref[...]                                    # (TM, 1) treatments
        emb = jnp.maximum(acc[:, 0:H] + bg_ref[...], 0.0)       # GCN relu
        a_t = acc[:, H:H + 1]                             # A @ T
        deg = acc[:, H + 1:H + 2]                         # row degree = A @ 1
        navg = a_t * pl.reciprocal(jnp.maximum(deg, 1e-12), approx=True)

        # Fused first layers of the three heads -> (TM, 3H).
        h1 = jnp.maximum(
            jnp.dot(emb, w1_ref[...], preferred_element_type=f32)
            + t * ct_ref[...] + navg * cn_ref[...] + b1_ref[...], 0.0)
        # Fused (block-diagonal) second layers -> (TM, 3H).
        h2 = jnp.maximum(
            jnp.dot(h1, w2_ref[...], preferred_element_type=f32) + b2_ref[...],
            0.0)
        # Fused (block-diagonal) output layers -> (TM, 3).
        logits = jnp.dot(h2, w3_ref[...], preferred_element_type=f32) + b3_ref[...]

        def sigmoid(x):                                   # stable; rides the EUP
            return 0.5 * (jnp.tanh(0.5 * x) + 1.0)

        out_ref[...] = jnp.zeros_like(out_ref)            # zero the lane padding
        out_ref[:, 0:H] = emb
        out_ref[:, H:H + 1] = sigmoid(logits[:, 0:1])         # pred_treatment
        out_ref[:, H + 1:H + 2] = sigmoid(logits[:, 1:2])     # pred_z
        out_ref[:, H + 2:H + 3] = logits[:, 2:3]              # pred_outcome0
        out_ref[:, H + 3:H + 4] = navg                        # neighborAverageT


# ---------------------------------------------------------------------------
# Parameters (PyTorch-style uniform(-1/sqrt(fan_in), 1/sqrt(fan_in)) init).
# ---------------------------------------------------------------------------
def init_params(key, xshape, hidden):
    def linear(k, fan_in, fan_out):
        kw, kb = jax.random.split(k)
        bound = 1.0 / jnp.sqrt(jnp.float32(fan_in))
        w = jax.random.uniform(kw, (fan_in, fan_out), jnp.float32, -bound, bound)
        b = jax.random.uniform(kb, (1, fan_out), jnp.float32, -bound, bound)
        return w, b

    keys = jax.random.split(key, 10)
    H = hidden
    p = {}
    # GCN layer (nfeat -> hidden)
    p["wg"], p["bg"] = linear(keys[0], xshape, H)
    # Discriminator (H -> H -> H -> 1)
    p["wd1"], p["bd1"] = linear(keys[1], H, H)
    p["wd2"], p["bd2"] = linear(keys[2], H, H)
    p["wd3"], p["bd3"] = linear(keys[3], H, 1)
    # Discriminator_z (H+1 -> H -> H -> 1); first-layer weight split row-wise
    wz1, p["bz1"] = linear(keys[4], H + 1, H)
    p["wz1e"], p["wz1t"] = wz1[:H, :], wz1[H:H + 1, :]
    p["wz2"], p["bz2"] = linear(keys[5], H, H)
    p["wz3"], p["bz3"] = linear(keys[6], H, 1)
    # Predictor (H+2 -> H -> H -> 1); first-layer weight split row-wise
    wp1, p["bp1"] = linear(keys[7], H + 2, H)
    p["wp1e"], p["wp1t"], p["wp1z"] = wp1[:H, :], wp1[H:H + 1, :], wp1[H + 1:, :]
    p["wp2"], p["bp2"] = linear(keys[8], H, H)
    p["wp3"], p["bp3"] = linear(keys[9], H, 1)
    return p


def _block_diag3(a, b, c):
    f32 = jnp.float32
    (ra, ca), (rb, cb), (rc, cc) = a.shape, b.shape, c.shape
    out = jnp.zeros((ra + rb + rc, ca + cb + cc), f32)
    out = out.at[:ra, :ca].set(a)
    out = out.at[ra:ra + rb, ca:ca + cb].set(b)
    out = out.at[ra + rb:, ca + cb:].set(c)
    return out


# ---------------------------------------------------------------------------
# Forward wrapper.
# ---------------------------------------------------------------------------
@functools.partial(jax.jit, static_argnames=("hidden",))
def net_estimator_forward(A, X, T, params, *, hidden):
    """Returns (pred_treatment, pred_z, pred_outcome0, embeddings, neighborAverageT)."""
    f32 = jnp.float32
    bf16 = jnp.bfloat16
    N = A.shape[0]
    F = X.shape[1]
    H = hidden
    RWp = _round_up(H + 2, 128)    # lane-dense fused right-operand width
    OWp = _round_up(H + 4, 128)    # lane-dense packed output width

    # ---- tile selection -----------------------------------------------------
    if N <= 2048:
        # Single reduction step: whole neighbour axis in one k tile (per-step
        # overhead dominates at small N).  Keep >= 2 row tiles when possible so
        # both v7x TensorCores get work.
        if N <= 256:
            TM = 128
        elif N <= 1024:
            TM = 256
        else:
            TM = 512
        Np_c = _round_up(N, 128)
        TK = Np_c
    else:
        # Streamed reduction: 0.5-2 MiB bf16 A tiles amortise the ~0.35us
        # per-grid-step overhead; column padding bounded by < 512.
        TM = 512
        Np_c = _round_up(N, 512)
        TK = 512
        for cand in (2048, 1024):
            if Np_c % cand == 0:
                TK = cand
                break
    Np_r = _round_up(N, TM)

    # ---- preprocessing: bf16 FIRST, then pad; rows/cols padded independently -
    A_p = jnp.pad(A.astype(bf16), ((0, Np_r - N), (0, Np_c - N)))
    X_c = jnp.pad(X.astype(f32), ((0, Np_c - N), (0, 0)))
    T_col = T.reshape(N, 1).astype(f32)
    T_c = jnp.pad(T_col, ((0, Np_c - N), (0, 0)))   # rows of R (= columns of A)
    T_r = jnp.pad(T_col, ((0, Np_r - N), (0, 0)))   # row tiles (finalize input)

    vmem = pl.BlockSpec(memory_space=pltpu.MemorySpace.VMEM)   # whole array resident

    # ---- prologue: R = [X @ Wg | T | 1 | 0-pad]  (bf16, lane width RWp) -----
    TMp = 512 if Np_c % 512 == 0 else 128
    r = pl.pallas_call(
        functools.partial(_support_kernel, hidden=H),
        out_shape=jax.ShapeDtypeStruct((Np_c, RWp), bf16),
        grid=(Np_c // TMp,),
        in_specs=[pl.BlockSpec((TMp, F), lambda i: (i, 0)),
                  pl.BlockSpec((TMp, 1), lambda i: (i, 0)),
                  vmem],
        out_specs=pl.BlockSpec((TMp, RWp), lambda i: (i, 0)),
        compiler_params=pltpu.CompilerParams(dimension_semantics=("parallel",)),
    )(X_c, T_c, params["wg"])

    # ---- fused head weights (concat / block-diag built once, outside kernel) -
    zH = jnp.zeros((1, H), f32)
    w1 = jnp.concatenate([params["wd1"], params["wz1e"], params["wp1e"]], axis=1)  # (H, 3H)
    ct = jnp.concatenate([zH, params["wz1t"], params["wp1t"]], axis=1)             # (1, 3H)
    cn = jnp.concatenate([zH, zH, params["wp1z"]], axis=1)                         # (1, 3H)
    b1 = jnp.concatenate([params["bd1"], params["bz1"], params["bp1"]], axis=1)    # (1, 3H)
    w2 = _block_diag3(params["wd2"], params["wz2"], params["wp2"])                 # (3H, 3H)
    b2 = jnp.concatenate([params["bd2"], params["bz2"], params["bp2"]], axis=1)    # (1, 3H)
    w3 = _block_diag3(params["wd3"], params["wz3"], params["wp3"])                 # (3H, 3)
    b3 = jnp.concatenate([params["bd3"], params["bz3"], params["bp3"]], axis=1)    # (1, 3)

    # ---- main kernel ----------------------------------------------------------
    out = pl.pallas_call(
        functools.partial(_netest_kernel, hidden=H),
        out_shape=jax.ShapeDtypeStruct((Np_r, OWp), f32),
        grid=(Np_r // TM, Np_c // TK),
        in_specs=[
            pl.BlockSpec((TM, TK), lambda i, k: (i, k)),    # A  (bf16, streamed)
            pl.BlockSpec((TK, RWp), lambda i, k: (k, 0)),   # R  (bf16, streamed by k)
            pl.BlockSpec((TM, 1), lambda i, k: (i, 0)),     # T  (row tile)
            vmem, vmem, vmem, vmem, vmem,                   # bg, w1, ct, cn, b1
            vmem, vmem, vmem, vmem,                         # w2, b2, w3, b3
        ],
        out_specs=pl.BlockSpec((TM, OWp), lambda i, k: (i, 0)),
        scratch_shapes=[pltpu.VMEM((TM, RWp), jnp.float32)],
        compiler_params=pltpu.CompilerParams(
            dimension_semantics=("parallel", "arbitrary")),
    )(A_p, r, T_r,
      params["bg"], w1, ct, cn, b1, w2, b2, w3, b3)

    emb = out[:N, 0:H]
    pred_t = out[:N, H:H + 1]
    pred_z = out[:N, H + 1:H + 2]
    pred_y = out[:N, H + 2]           # .view(-1) in torch
    navg = out[:N, H + 3]             # torch.div of (N,) vectors -> (N,)
    return pred_t, pred_z, pred_y, emb, navg


# ---------------------------------------------------------------------------
# Pure-JAX reference (for a smoke-test comparison).
# ---------------------------------------------------------------------------
def _reference_forward(A, X, T, params, hidden):
    f32 = jnp.float32
    A = A.astype(f32)
    X = X.astype(f32)
    Tc = T.reshape(-1, 1).astype(f32)
    p = params

    def mlp(x, w1, b1, w2, b2, w3, b3):
        h = jnp.maximum(x @ w1 + b1, 0.0)
        h = jnp.maximum(h @ w2 + b2, 0.0)
        return h @ w3 + b3

    emb = jnp.maximum(A @ (X @ p["wg"]) + p["bg"], 0.0)
    pred_t = jax.nn.sigmoid(mlp(emb, p["wd1"], p["bd1"], p["wd2"], p["bd2"],
                                p["wd3"], p["bd3"]))
    deg = jnp.sum(A, axis=1, keepdims=True)
    navg = (A @ Tc) / jnp.maximum(deg, 1e-12)
    et = jnp.concatenate([emb, Tc], axis=1)
    wz1 = jnp.concatenate([p["wz1e"], p["wz1t"]], axis=0)
    pred_z = jax.nn.sigmoid(mlp(et, wz1, p["bz1"], p["wz2"], p["bz2"],
                                p["wz3"], p["bz3"]))
    etz = jnp.concatenate([et, navg], axis=1)
    wp1 = jnp.concatenate([p["wp1e"], p["wp1t"], p["wp1z"]], axis=0)
    pred_y = mlp(etz, wp1, p["bp1"], p["wp2"], p["bp2"], p["wp3"],
                 p["bp3"]).reshape(-1)
    return pred_t, pred_z, pred_y, emb, navg.reshape(-1)


if __name__ == "__main__":
    N, F, HIDDEN = 200, 16, 32   # nodes, feature dim, hidden width

    key = jax.random.PRNGKey(0)
    k_a, k_x, k_t, k_p = jax.random.split(key, 4)

    # Symmetric 0/1 adjacency with self-loops (no zero-degree nodes).
    A = (jax.random.uniform(k_a, (N, N)) < 0.05).astype(jnp.float32)
    A = jnp.maximum(A, A.T)
    A = A.at[jnp.arange(N), jnp.arange(N)].set(1.0)

    X = jax.random.normal(k_x, (N, F), jnp.float32)
    T = (jax.random.uniform(k_t, (N,)) < 0.5).astype(jnp.float32)

    params = init_params(k_p, F, HIDDEN)

    outs = net_estimator_forward(A, X, T, params, hidden=HIDDEN)
    outs = jax.block_until_ready(outs)
    pred_treatment, pred_z, pred_outcome0, embeddings, neighborAverageT = outs

    assert pred_treatment.shape == (N, 1)
    assert pred_z.shape == (N, 1)
    assert pred_outcome0.shape == (N,)
    assert embeddings.shape == (N, HIDDEN)
    assert neighborAverageT.shape == (N,)

    refs = _reference_forward(A, X, T, params, HIDDEN)
    for got, ref in zip(outs, refs):
        assert got.shape == ref.shape
        assert bool(jnp.all(jnp.isfinite(got)))
        assert bool(jnp.allclose(got, ref, rtol=5e-2, atol=5e-2)), \
            float(jnp.max(jnp.abs(got - ref)))

    print("KERNEL_OK")
</pallas_src>

<mosaic_0001>
module attributes {stable_mosaic.version = 11 : i64} {
  func.func @_support_kernel(%arg0: i32, %arg1: memref<128x16xf32, #tpu.memory_space<vmem>>, %arg2: memref<128x1xf32, #tpu.memory_space<vmem>>, %arg3: memref<16x32xf32, #tpu.memory_space<vmem>>, %arg4: memref<128x128xbf16, #tpu.memory_space<vmem>>) attributes {dimension_semantics = [#tpu.dimension_semantics<parallel>], iteration_bounds = array<i64: 2>, scalar_prefetch = 0 : i64, scratch_operands = 0 : i64, tpu.core_type = #tpu.core_type<tc>, window_params = [{transform_indices = @transform_0, window_bounds = array<i64: 128, 16>}, {transform_indices = @transform_1, window_bounds = array<i64: 128, 1>}, {pipeline_mode = #tpu.pipeline_mode<synchronous>, transform_indices = @transform_2, window_bounds = array<i64: 16, 32>}, {transform_indices = @transform_3, window_bounds = array<i64: 128, 128>}]} {
    %c0 = arith.constant 0 : index
    %c0_0 = arith.constant 0 : index
    %0 = vector.load %arg1[%c0, %c0_0] : memref<128x16xf32, #tpu.memory_space<vmem>>, vector<128x16xf32>
    %c0_1 = arith.constant 0 : index
    %c0_2 = arith.constant 0 : index
    %1 = vector.load %arg3[%c0_1, %c0_2] : memref<16x32xf32, #tpu.memory_space<vmem>>, vector<16x32xf32>
    %cst = arith.constant dense<0.000000e+00> : vector<128x32xf32>
    %2 = tpu.matmul %0, %1, %cst {dimension_numbers = #tpu.dot_dimension_numbers<[1], [0], [0], [1], [0, 0, 1, 1], [], []>} : vector<128x16xf32>, vector<16x32xf32>, vector<128x32xf32> -> vector<128x32xf32>
    %c0_3 = arith.constant 0 : index
    %c0_4 = arith.constant 0 : index
    %3 = vector.load %arg2[%c0_3, %c0_4] : memref<128x1xf32, #tpu.memory_space<vmem>>, vector<128x1xf32>
    %cst_5 = arith.constant 0.000000e+00 : bf16
    %4 = vector.broadcast %cst_5 : bf16 to vector<128x128xbf16>
    %c0_6 = arith.constant 0 : index
    %c0_7 = arith.constant 0 : index
    %5 = vector.load %arg4[%c0_6, %c0_7] : memref<128x128xbf16, #tpu.memory_space<vmem>>, vector<128x128xbf16>
    tpu.vector_store %arg4[%c0_6, %c0_7], %4 {strides = array<i32>} : memref<128x128xbf16, #tpu.memory_space<vmem>>, vector<128x128xbf16>,
    %6 = arith.truncf %2 : vector<128x32xf32> to vector<128x32xbf16>
    %c0_8 = arith.constant 0 : index
    %c0_9 = arith.constant 0 : index
    %7 = vector.load %arg4[%c0_8, %c0_9] : memref<128x128xbf16, #tpu.memory_space<vmem>>, vector<128x32xbf16>
    tpu.vector_store %arg4[%c0_8, %c0_9], %6 {strides = array<i32>} : memref<128x128xbf16, #tpu.memory_space<vmem>>, vector<128x32xbf16>,
    %8 = arith.truncf %3 : vector<128x1xf32> to vector<128x1xbf16>
    %c0_10 = arith.constant 0 : index
    %c32 = arith.constant 32 : index
    %9 = vector.load %arg4[%c0_10, %c32] : memref<128x128xbf16, #tpu.memory_space<vmem>>, vector<128x1xbf16>
    tpu.vector_store %arg4[%c0_10, %c32], %8 {strides = array<i32>} : memref<128x128xbf16, #tpu.memory_space<vmem>>, vector<128x1xbf16>,
    %cst_11 = arith.constant 1.000000e+00 : f32
    %10 = vector.broadcast %cst_11 : f32 to vector<128x1xf32>
    %11 = arith.truncf %10 : vector<128x1xf32> to vector<128x1xbf16>
    %c0_12 = arith.constant 0 : index
    %c33 = arith.constant 33 : index
    %12 = vector.load %arg4[%c0_12, %c33] : memref<128x128xbf16, #tpu.memory_space<vmem>>, vector<128x1xbf16>
    tpu.vector_store %arg4[%c0_12, %c33], %11 {strides = array<i32>} : memref<128x128xbf16, #tpu.memory_space<vmem>>, vector<128x1xbf16>,
    return
  }
  func.func @transform_0(%arg0: i32) -> (i32, i32) {
    %c0_i32 = arith.constant 0 : i32
    %c0_i32_0 = arith.constant 0 : i32
    return %arg0, %c0_i32 : i32, i32
  }
  func.func @transform_1(%arg0: i32) -> (i32, i32) {
    %c0_i32 = arith.constant 0 : i32
    %c0_i32_0 = arith.constant 0 : i32
    return %arg0, %c0_i32 : i32, i32
  }
  func.func @transform_2(%arg0: i32) -> (i32, i32) {
    %c0_i32 = arith.constant 0 : i32
    %c0_i32_0 = arith.constant 0 : i32
    %c0_i32_1 = arith.constant 0 : i32
    return %c0_i32, %c0_i32_0 : i32, i32
  }
  func.func @transform_3(%arg0: i32) -> (i32, i32) {
    %c0_i32 = arith.constant 0 : i32
    %c0_i32_0 = arith.constant 0 : i32
    return %arg0, %c0_i32 : i32, i32
  }
}

module attributes {stable_mosaic.version = 11 : i64} {
  func.func @_netest_kernel(%arg0: i32, %arg1: i32, %arg2: memref<128x256xbf16, #tpu.memory_space<vmem>>, %arg3: memref<256x128xbf16, #tpu.memory_space<vmem>>, %arg4: memref<128x1xf32, #tpu.memory_space<vmem>>, %arg5: memref<1x32xf32, #tpu.memory_space<vmem>>, %arg6: memref<32x96xf32, #tpu.memory_space<vmem>>, %arg7: memref<1x96xf32, #tpu.memory_space<vmem>>, %arg8: memref<1x96xf32, #tpu.memory_space<vmem>>, %arg9: memref<1x96xf32, #tpu.memory_space<vmem>>, %arg10: memref<96x96xf32, #tpu.memory_space<vmem>>, %arg11: memref<1x96xf32, #tpu.memory_space<vmem>>, %arg12: memref<96x3xf32, #tpu.memory_space<vmem>>, %arg13: memref<1x3xf32, #tpu.memory_space<vmem>>, %arg14: memref<128x128xf32, #tpu.memory_space<vmem>>, %arg15: memref<128x128xf32, #tpu.memory_space<vmem>>) attributes {dimension_semantics = [#tpu.dimension_semantics<parallel>, #tpu.dimension_semantics<arbitrary>], iteration_bounds = array<i64: 2, 1>, scalar_prefetch = 0 : i64, scratch_operands = 1 : i64, tpu.core_type = #tpu.core_type<tc>, window_params = [{transform_indices = @transform_0, window_bounds = array<i64: 128, 256>}, {transform_indices = @transform_1, window_bounds = array<i64: 256, 128>}, {transform_indices = @transform_2, window_bounds = array<i64: 128, 1>}, {pipeline_mode = #tpu.pipeline_mode<synchronous>, transform_indices = @transform_3, window_bounds = array<i64: 1, 32>}, {pipeline_mode = #tpu.pipeline_mode<synchronous>, transform_indices = @transform_4, window_bounds = array<i64: 32, 96>}, {pipeline_mode = #tpu.pipeline_mode<synchronous>, transform_indices = @transform_5, window_bounds = array<i64: 1, 96>}, {pipeline_mode = #tpu.pipeline_mode<synchronous>, transform_indices = @transform_6, window_bounds = array<i64: 1, 96>}, {pipeline_mode = #tpu.pipeline_mode<synchronous>, transform_indices = @transform_7, window_bounds = array<i64: 1, 96>}, {pipeline_mode = #tpu.pipeline_mode<synchronous>, transform_indices = @transform_8, window_bounds = array<i64: 96, 96>}, {pipeline_mode = #tpu.pipeline_mode<synchronous>, transform_indices = @transform_9, window_bounds = array<i64: 1, 96>}, {pipeline_mode = #tpu.pipeline_mode<synchronous>, transform_indices = @transform_10, window_bounds = array<i64: 96, 3>}, {pipeline_mode = #tpu.pipeline_mode<synchronous>, transform_indices = @transform_11, window_bounds = array<i64: 1, 3>}, {transform_indices = @transform_12, window_bounds = array<i64: 128, 128>}]} {
    %c0_i32 = arith.constant 0 : i32
    %0 = arith.cmpi eq, %arg1, %c0_i32 : i32
    %1 = arith.extui %0 : i1 to i32
    %c0_i32_0 = arith.constant 0 : i32
    %2 = arith.cmpi ne, %1, %c0_i32_0 : i32
    scf.if %2 {
      %cst_10 = arith.constant 0.000000e+00 : f32
      %12 = vector.broadcast %cst_10 : f32 to vector<128x128xf32>
      %c0_11 = arith.constant 0 : index
      %c0_12 = arith.constant 0 : index
      %13 = vector.load %arg15[%c0_11, %c0_12] : memref<128x128xf32, #tpu.memory_space<vmem>>, vector<128x128xf32>
      tpu.vector_store %arg15[%c0_11, %c0_12], %12 {strides = array<i32>} : memref<128x128xf32, #tpu.memory_space<vmem>>, vector<128x128xf32>,
    } else {
    }
    %c0 = arith.constant 0 : index
    %c0_1 = arith.constant 0 : index
    %3 = vector.load %arg15[%c0, %c0_1] : memref<128x128xf32, #tpu.memory_space<vmem>>, vector<128x128xf32>
    %c0_2 = arith.constant 0 : index
    %c0_3 = arith.constant 0 : index
    %4 = vector.load %arg2[%c0_2, %c0_3] : memref<128x256xbf16, #tpu.memory_space<vmem>>, vector<128x256xbf16>
    %c0_4 = arith.constant 0 : index
    %c0_5 = arith.constant 0 : index
    %5 = vector.load %arg3[%c0_4, %c0_5] : memref<256x128xbf16, #tpu.memory_space<vmem>>, vector<256x128xbf16>
    %cst = arith.constant dense<0.000000e+00> : vector<128x128xf32>
    %6 = tpu.matmul %4, %5, %cst {dimension_numbers = #tpu.dot_dimension_numbers<[1], [0], [0], [1], [0, 0, 1, 1], [], []>} : vector<128x256xbf16>, vector<256x128xbf16>, vector<128x128xf32> -> vector<128x128xf32>
    %7 = arith.addf %3, %6 : vector<128x128xf32>
    %c0_6 = arith.constant 0 : index
    %c0_7 = arith.constant 0 : index
    %8 = vector.load %arg15[%c0_6, %c0_7] : memref<128x128xf32, #tpu.memory_space<vmem>>, vector<128x128xf32>
    tpu.vector_store %arg15[%c0_6, %c0_7], %7 {strides = array<i32>} : memref<128x128xf32, #tpu.memory_space<vmem>>, vector<128x128xf32>,
    %c0_i32_8 = arith.constant 0 : i32
    %9 = arith.cmpi eq, %arg1, %c0_i32_8 : i32
    %10 = arith.extui %9 : i1 to i32
    %c0_i32_9 = arith.constant 0 : i32
    %11 = arith.cmpi ne, %10, %c0_i32_9 : i32
    scf.if %11 {
      %c0_10 = arith.constant 0 : index
      %c0_11 = arith.constant 0 : index
      %12 = vector.load %arg15[%c0_10, %c0_11] : memref<128x128xf32, #tpu.memory_space<vmem>>, vector<128x128xf32>
      %c0_12 = arith.constant 0 : index
      %c0_13 = arith.constant 0 : index
      %13 = vector.load %arg4[%c0_12, %c0_13] : memref<128x1xf32, #tpu.memory_space<vmem>>, vector<128x1xf32>
      %14 = vector.extract_strided_slice %12 {offsets = [0, 0], sizes = [128, 32], strides = [1, 1]} : vector<128x128xf32> to vector<128x32xf32>
      %c0_14 = arith.constant 0 : index
      %c0_15 = arith.constant 0 : index
      %15 = vector.load %arg5[%c0_14, %c0_15] : memref<1x32xf32, #tpu.memory_space<vmem>>, vector<1x32xf32>
      %16 = vector.broadcast %15 : vector<1x32xf32> to vector<128x32xf32>
      %17 = arith.addf %14, %16 : vector<128x32xf32>
      %cst_16 = arith.constant 0.000000e+00 : f32
      %18 = vector.broadcast %cst_16 : f32 to vector<128x32xf32>
      %19 = arith.maximumf %17, %18 : vector<128x32xf32>
      %20 = vector.extract_strided_slice %12 {offsets = [0, 32], sizes = [128, 1], strides = [1, 1]} : vector<128x128xf32> to vector<128x1xf32>
      %21 = vector.extract_strided_slice %12 {offsets = [0, 33], sizes = [128, 1], strides = [1, 1]} : vector<128x128xf32> to vector<128x1xf32>
      %cst_17 = arith.constant 9.99999996E-13 : f32
      %22 = vector.broadcast %cst_17 : f32 to vector<128x1xf32>
      %23 = arith.maximumf %21, %22 : vector<128x1xf32>
      %24 = tpu.reciprocal %23 {approx = true} : vector<128x1xf32> -> vector<128x1xf32>
      %25 = arith.mulf %20, %24 : vector<128x1xf32>
      %c0_18 = arith.constant 0 : index
      %c0_19 = arith.constant 0 : index
      %26 = vector.load %arg6[%c0_18, %c0_19] : memref<32x96xf32, #tpu.memory_space<vmem>>, vector<32x96xf32>
      %cst_20 = arith.constant dense<0.000000e+00> : vector<128x96xf32>
      %27 = tpu.matmul %19, %26, %cst_20 {dimension_numbers = #tpu.dot_dimension_numbers<[1], [0], [0], [1], [0, 0, 1, 1], [], []>} : vector<128x32xf32>, vector<32x96xf32>, vector<128x96xf32> -> vector<128x96xf32>
      %c0_21 = arith.constant 0 : index
      %c0_22 = arith.constant 0 : index
      %28 = vector.load %arg7[%c0_21, %c0_22] : memref<1x96xf32, #tpu.memory_space<vmem>>, vector<1x96xf32>
      %29 = vector.broadcast %13 : vector<128x1xf32> to vector<128x96xf32>
      %30 = vector.broadcast %28 : vector<1x96xf32> to vector<128x96xf32>
      %31 = arith.mulf %29, %30 : vector<128x96xf32>
      %32 = arith.addf %27, %31 : vector<128x96xf32>
      %c0_23 = arith.constant 0 : index
      %c0_24 = arith.constant 0 : index
      %33 = vector.load %arg8[%c0_23, %c0_24] : memref<1x96xf32, #tpu.memory_space<vmem>>, vector<1x96xf32>
      %34 = vector.broadcast %25 : vector<128x1xf32> to vector<128x96xf32>
      %35 = vector.broadcast %33 : vector<1x96xf32> to vector<128x96xf32>
      %36 = arith.mulf %34, %35 : vector<128x96xf32>
      %37 = arith.addf %32, %36 : vector<128x96xf32>
      %c0_25 = arith.constant 0 : index
      %c0_26 = arith.constant 0 : index
      %38 = vector.load %arg9[%c0_25, %c0_26] : memref<1x96xf32, #tpu.memory_space<vmem>>, vector<1x96xf32>
      %39 = vector.broadcast %38 : vector<1x96xf32> to vector<128x96xf32>
      %40 = arith.addf %37, %39 : vector<128x96xf32>
      %cst_27 = arith.constant 0.000000e+00 : f32
      %41 = vector.broadcast %cst_27 : f32 to vector<128x96xf32>
      %42 = arith.maximumf %40, %41 : vector<128x96xf32>
      %c0_28 = arith.constant 0 : index
      %c0_29 = arith.constant 0 : index
      %43 = vector.load %arg10[%c0_28, %c0_29] : memref<96x96xf32, #tpu.memory_space<vmem>>, vector<96x96xf32>
      %cst_30 = arith.constant dense<0.000000e+00> : vector<128x96xf32>
      %44 = tpu.matmul %42, %43, %cst_30 {dimension_numbers = #tpu.dot_dimension_numbers<[1], [0], [0], [1], [0, 0, 1, 1], [], []>} : vector<128x96xf32>, vector<96x96xf32>, vector<128x96xf32> -> vector<128x96xf32>
      %c0_31 = arith.constant 0 : index
      %c0_32 = arith.constant 0 : index
      %45 = vector.load %arg11[%c0_31, %c0_32] : memref<1x96xf32, #tpu.memory_space<vmem>>, vector<1x96xf32>
      %46 = vector.broadcast %45 : vector<1x96xf32> to vector<128x96xf32>
      %47 = arith.addf %44, %46 : vector<128x96xf32>
      %cst_33 = arith.constant 0.000000e+00 : f32
      %48 = vector.broadcast %cst_33 : f32 to vector<128x96xf32>
      %49 = arith.maximumf %47, %48 : vector<128x96xf32>
      %c0_34 = arith.constant 0 : index
      %c0_35 = arith.constant 0 : index
      %50 = vector.load %arg12[%c0_34, %c0_35] : memref<96x3xf32, #tpu.memory_space<vmem>>, vector<96x3xf32>
      %cst_36 = arith.constant dense<0.000000e+00> : vector<128x3xf32>
      %51 = tpu.matmul %49, %50, %cst_36 {dimension_numbers = #tpu.dot_dimension_numbers<[1], [0], [0], [1], [0, 0, 1, 1], [], []>} : vector<128x96xf32>, vector<96x3xf32>, vector<128x3xf32> -> vector<128x3xf32>
      %c0_37 = arith.constant 0 : index
      %c0_38 = arith.constant 0 : index
      %52 = vector.load %arg13[%c0_37, %c0_38] : memref<1x3xf32, #tpu.memory_space<vmem>>, vector<1x3xf32>
      %53 = vector.broadcast %52 : vector<1x3xf32> to vector<128x3xf32>
      %54 = arith.addf %51, %53 : vector<128x3xf32>
      %cst_39 = arith.constant 0.000000e+00 : f32
      %55 = vector.broadcast %cst_39 : f32 to vector<128x128xf32>
      %c0_40 = arith.constant 0 : index
      %c0_41 = arith.constant 0 : index
      %56 = vector.load %arg14[%c0_40, %c0_41] : memref<128x128xf32, #tpu.memory_space<vmem>>, vector<128x128xf32>
      tpu.vector_store %arg14[%c0_40, %c0_41], %55 {strides = array<i32>} : memref<128x128xf32, #tpu.memory_space<vmem>>, vector<128x128xf32>,
      %c0_42 = arith.constant 0 : index
      %c0_43 = arith.constant 0 : index
      %57 = vector.load %arg14[%c0_42, %c0_43] : memref<128x128xf32, #tpu.memory_space<vmem>>, vector<128x32xf32>
      tpu.vector_store %arg14[%c0_42, %c0_43], %19 {strides = array<i32>} : memref<128x128xf32, #tpu.memory_space<vmem>>, vector<128x32xf32>,
      %58 = vector.extract_strided_slice %54 {offsets = [0, 0], sizes = [128, 1], strides = [1, 1]} : vector<128x3xf32> to vector<128x1xf32>
      %cst_44 = arith.constant 5.000000e-01 : f32
      %59 = vector.broadcast %cst_44 : f32 to vector<128x1xf32>
      %60 = arith.mulf %59, %58 : vector<128x1xf32>
      %61 = math.tanh %60 : vector<128x1xf32>
      %cst_45 = arith.constant 1.000000e+00 : f32
      %62 = vector.broadcast %cst_45 : f32 to vector<128x1xf32>
      %63 = arith.addf %61, %62 : vector<128x1xf32>
      %cst_46 = arith.constant 5.000000e-01 : f32
      %64 = vector.broadcast %cst_46 : f32 to vector<128x1xf32>
      %65 = arith.mulf %64, %63 : vector<128x1xf32>
      %c0_47 = arith.constant 0 : index
      %c32 = arith.constant 32 : index
      %66 = vector.load %arg14[%c0_47, %c32] : memref<128x128xf32, #tpu.memory_space<vmem>>, vector<128x1xf32>
      tpu.vector_store %arg14[%c0_47, %c32], %65 {strides = array<i32>} : memref<128x128xf32, #tpu.memory_space<vmem>>, vector<128x1xf32>,
      %67 = vector.extract_strided_slice %54 {offsets = [0, 1], sizes = [128, 1], strides = [1, 1]} : vector<128x3xf32> to vector<128x1xf32>
      %cst_48 = arith.constant 5.000000e-01 : f32
      %68 = vector.broadcast %cst_48 : f32 to vector<128x1xf32>
      %69 = arith.mulf %68, %67 : vector<128x1xf32>
      %70 = math.tanh %69 : vector<128x1xf32>
      %cst_49 = arith.constant 1.000000e+00 : f32
      %71 = vector.broadcast %cst_49 : f32 to vector<128x1xf32>
      %72 = arith.addf %70, %71 : vector<128x1xf32>
      %cst_50 = arith.constant 5.000000e-01 : f32
      %73 = vector.broadcast %cst_50 : f32 to vector<128x1xf32>
      %74 = arith.mulf %73, %72 : vector<128x1xf32>
      %c0_51 = arith.constant 0 : index
      %c33 = arith.constant 33 : index
      %75 = vector.load %arg14[%c0_51, %c33] : memref<128x128xf32, #tpu.memory_space<vmem>>, vector<128x1xf32>
      tpu.vector_store %arg14[%c0_51, %c33], %74 {strides = array<i32>} : memref<128x128xf32, #tpu.memory_space<vmem>>, vector<128x1xf32>,
      %76 = vector.extract_strided_slice %54 {offsets = [0, 2], sizes = [128, 1], strides = [1, 1]} : vector<128x3xf32> to vector<128x1xf32>
      %c0_52 = arith.constant 0 : index
      %c34 = arith.constant 34 : index
      %77 = vector.load %arg14[%c0_52, %c34] : memref<128x128xf32, #tpu.memory_space<vmem>>, vector<128x1xf32>
      tpu.vector_store %arg14[%c0_52, %c34], %76 {strides = array<i32>} : memref<128x128xf32, #tpu.memory_space<vmem>>, vector<128x1xf32>,
      %c0_53 = arith.constant 0 : index
      %c35 = arith.constant 35 : index
      %78 = vector.load %arg14[%c0_53, %c35] : memref<128x128xf32, #tpu.memory_space<vmem>>, vector<128x1xf32>
      tpu.vector_store %arg14[%c0_53, %c35], %25 {strides = array<i32>} : memref<128x128xf32, #tpu.memory_space<vmem>>, vector<128x1xf32>,
    } else {
    }
    return
  }
  func.func @transform_0(%arg0: i32, %arg1: i32) -> (i32, i32) {
    %c0_i32 = arith.constant 0 : i32
    return %arg0, %arg1 : i32, i32
  }
  func.func @transform_1(%arg0: i32, %arg1: i32) -> (i32, i32) {
    %c0_i32 = arith.constant 0 : i32
    %c0_i32_0 = arith.constant 0 : i32
    return %arg1, %c0_i32 : i32, i32
  }
  func.func @transform_2(%arg0: i32, %arg1: i32) -> (i32, i32) {
    %c0_i32 = arith.constant 0 : i32
    %c0_i32_0 = arith.constant 0 : i32
    return %arg0, %c0_i32 : i32, i32
  }
  func.func @transform_3(%arg0: i32, %arg1: i32) -> (i32, i32) {
    %c0_i32 = arith.constant 0 : i32
    %c0_i32_0 = arith.constant 0 : i32
    %c0_i32_1 = arith.constant 0 : i32
    return %c0_i32, %c0_i32_0 : i32, i32
  }
  func.func @transform_4(%arg0: i32, %arg1: i32) -> (i32, i32) {
    %c0_i32 = arith.constant 0 : i32
    %c0_i32_0 = arith.constant 0 : i32
    %c0_i32_1 = arith.constant 0 : i32
    return %c0_i32, %c0_i32_0 : i32, i32
  }
  func.func @transform_5(%arg0: i32, %arg1: i32) -> (i32, i32) {
    %c0_i32 = arith.constant 0 : i32
    %c0_i32_0 = arith.constant 0 : i32
    %c0_i32_1 = arith.constant 0 : i32
    return %c0_i32, %c0_i32_0 : i32, i32
  }
  func.func @transform_6(%arg0: i32, %arg1: i32) -> (i32, i32) {
    %c0_i32 = arith.constant 0 : i32
    %c0_i32_0 = arith.constant 0 : i32
    %c0_i32_1 = arith.constant 0 : i32
    return %c0_i32, %c0_i32_0 : i32, i32
  }
  func.func @transform_7(%arg0: i32, %arg1: i32) -> (i32, i32) {
    %c0_i32 = arith.constant 0 : i32
    %c0_i32_0 = arith.constant 0 : i32
    %c0_i32_1 = arith.constant 0 : i32
    return %c0_i32, %c0_i32_0 : i32, i32
  }
  func.func @transform_8(%arg0: i32, %arg1: i32) -> (i32, i32) {
    %c0_i32 = arith.constant 0 : i32
    %c0_i32_0 = arith.constant 0 : i32
    %c0_i32_1 = arith.constant 0 : i32
    return %c0_i32, %c0_i32_0 : i32, i32
  }
  func.func @transform_9(%arg0: i32, %arg1: i32) -> (i32, i32) {
    %c0_i32 = arith.constant 0 : i32
    %c0_i32_0 = arith.constant 0 : i32
    %c0_i32_1 = arith.constant 0 : i32
    return %c0_i32, %c0_i32_0 : i32, i32
  }
  func.func @transform_10(%arg0: i32, %arg1: i32) -> (i32, i32) {
    %c0_i32 = arith.constant 0 : i32
    %c0_i32_0 = arith.constant 0 : i32
    %c0_i32_1 = arith.constant 0 : i32
    return %c0_i32, %c0_i32_0 : i32, i32
  }
  func.func @transform_11(%arg0: i32, %arg1: i32) -> (i32, i32) {
    %c0_i32 = arith.constant 0 : i32
    %c0_i32_0 = arith.constant 0 : i32
    %c0_i32_1 = arith.constant 0 : i32
    return %c0_i32, %c0_i32_0 : i32, i32
  }
  func.func @transform_12(%arg0: i32, %arg1: i32) -> (i32, i32) {
    %c0_i32 = arith.constant 0 : i32
    %c0_i32_0 = arith.constant 0 : i32
    return %arg0, %c0_i32 : i32, i32
  }
}

</mosaic_0001>

<bundles_post_ra>
// kernel: net_estimator_forward.2
= control target key start
LH: loop header
LB: loop body
LE: loop exit
PB: predicated region body
PF: predicated region fallthrough
CT: control target
= control target key end

     0   :  { %s906_s12 = smov 0   ;;  %s1146_s0 = inlined_call_operand.vmem [shape: f32[256,16], index: 0, kind: input, shape index: {}]   ;;  %s1147_s1 = inlined_call_operand.vmem [shape: f32[256,1], index: 1, kind: input, shape index: {}]   ;;  %s1148_s2 = inlined_call_operand.vmem [shape: f32[16,32], index: 2, kind: input, shape index: {}]   ;;  %s1149_s3 = inlined_call_operand.vmem [shape: bf16[256,128], index: 3, kind: output, shape index: {}]  }
   0x1 LB: > { %s721_s13 = sadd.s32 4294967295, %s881_s12   ;;  %p725_p0 = scmp.ge.s32.totalorder %s881_s12, 1  ;;  %s881_s12 = sphi %s906_s12, %s13_s12  }
   0x2   : > { %p149_p1 = scmp.lt.s32.totalorder %s881_s12, 3 }
   0x4   : > { %p150_p2 = pnand %p725_p0, %p149_p1 }
   0x5   : > { %s726_s18 = sshll.u32 (!%p150_p2), %s721_s13, 4  ;;  %s883_s26 = smov (!%p150_p2), 32  }
   0x6   : > { %153 = sbr.rel (%p150_p2) target bundleno = 236 (0xec), region = 32  ;;  %p179_p3 = scmp.lt.s32.totalorder (!%p150_p2), %s726_s18, 31 }
   0xb   : > { %v215_v0 = vld [vmem:[%s1148_s2 + $0x8] sm:$0xff]  ;;  %v214_v1 = vld [vmem:[%s1148_s2] sm:$0xff]  ;;  %s1151_s18 = smov (!%p179_p3, %s726_s18), 31  ;;  %vm216_vm0 = vcmask 130048   ;;  %v884_v50 = vmov 0   ;;  %vm506_vm1 = vcmask 257024  }
   0xc   : > { %832 = vmatprep.subr.mxu0 %v215_v0  ;;  %860 = vmatprep.subr.mxu1 %v215_v0  ;;  %s727_s19 = sshll.u32 %s1151_s18, 3  ;;  %s731_s27 = sshll.u32 %s1151_s18, 2  ;;  %vm619_vm2 = vcmask 265472   ;;  %vm636_vm3 = vcmask 273672  }
   0xd   : > { %833 = vmatpush3.msra.mxu0 %v215_v0  ;;  %862 = vmatpush3.msra.mxu1 %v215_v0  ;;  %s926_s22 = scalar_lea.vmem %s1146_s0, %s727_s19  ;;  %s941_s25 = scalar_lea.vmem %s1147_s1, %s727_s19 }
   0xe   : > { %834 = vmatprep.subr.mxu0 %v214_v1  ;;  %861 = vmatprep.subr.mxu1 %v214_v1  ;;  %v198_v2 = vld [vmem:[%s926_s22] sm:$0xff]  ;;  %v199_v4 = vld [vmem:[%s926_s22 + $0x8] sm:$0xff]  ;;  %v200_v6 = vld [vmem:[%s926_s22 + $0x10] sm:$0xff]  ;;  %s1001_s30 = scalar_lea.vmem %s1149_s3, %s731_s27 }
   0xf   : > { %835 = vmatpush3.msra.mxu0 %v214_v1  ;;  %863 = vmatpush3.msra.mxu1 %v214_v1  ;;  %v206_v3 = vld [vmem:[%s926_s22 + $0x40] sm:$0xff]  ;;  %v207_v5 = vld [vmem:[%s926_s22 + $0x48] sm:$0xff]  ;;  %v208_v7 = vld [vmem:[%s926_s22 + $0x50] sm:$0xff]  ;;  %427 = vst [vmem:[%s1001_s30 + $0x4] sm:$0xf] %v884_v50 }
  0x10   : > { %836 = vmatprep.mubr.msk.f32.mxu0 %vm216_vm0, %v198_v2  ;;  %848 = vmatprep.mubr.msk.f32.mxu1 %vm216_vm0, %v206_v3  ;;  %v201_v8 = vld [vmem:[%s926_s22 + $0x18] sm:$0xff]  ;;  %v202_v10 = vld [vmem:[%s926_s22 + $0x20] sm:$0xff]  ;;  %v412_v12 = vld [vmem:[%s941_s25 + $0x10] sm:$0xff]  ;;  %426 = vst [vmem:[%s1001_s30] sm:$0xf] %v884_v50 }
  0x11   : > { %837 = vmatmul.mubr.msk.f32.vlgmr.msra.gmra.mxu0 %vm216_vm0, %v199_v4  ;;  %849 = vmatmul.mubr.msk.f32.vlgmr.msra.gmra.mxu1 %vm216_vm0, %v207_v5  ;;  %v209_v9 = vld [vmem:[%s926_s22 + $0x58] sm:$0xff]  ;;  %v210_v11 = vld [vmem:[%s926_s22 + $0x60] sm:$0xff]  ;;  %v800_v14 = vpack.c.bf16 %v412_v12, %v412_v12  ;;  %v411_v17 = vld [vmem:[%s941_s25 + $0x8] sm:$0xff]  ;;  %428 = vst [vmem:[%s1001_s30 + $0x8] sm:$0xf] %v884_v50 }
  0x12   : > { %839 = vmatprep.mubr.msk.f32.mxu0 %vm216_vm0, %v200_v6  ;;  %851 = vmatprep.mubr.msk.f32.mxu1 %vm216_vm0, %v208_v7  ;;  %v410_v13 = vld [vmem:[%s941_s25] sm:$0xff]  ;;  %v413_v16 = vld [vmem:[%s941_s25 + $0x18] sm:$0xff]  ;;  %v203_v18 = vld [vmem:[%s926_s22 + $0x28] sm:$0xff]  ;;  %v799_v23 = vpack.c.bf16 %v411_v17, %v411_v17  ;;  %429 = vst [vmem:[%s1001_s30 + $0xc] sm:$0xf] %v884_v50 }
  0x13   : > { %v798_v15 = vpack.c.bf16 %v410_v13, %v410_v13  ;;  %v211_v19 = vld [vmem:[%s926_s22 + $0x68] sm:$0xff]  ;;  %v204_v20 = vld [vmem:[%s926_s22 + $0x30] sm:$0xff]  ;;  %575 = vrot.lane.b32.xlu1 %v800_v14, %s883_s26  ;;  %v801_v22 = vpack.c.bf16 %v413_v16, %v413_v16  ;;  %v414_v25 = vld [vmem:[%s941_s25 + $0x20] sm:$0xff] }
  0x14   : > { %v212_v21 = vld [vmem:[%s926_s22 + $0x70] sm:$0xff]  ;;  %v415_v24 = vld [vmem:[%s941_s25 + $0x28] sm:$0xff]  ;;  %v205_v26 = vld [vmem:[%s926_s22 + $0x38] sm:$0xff]  ;;  %v802_v29 = vpack.c.bf16 %v414_v25, %v414_v25  ;;  %430 = vst [vmem:[%s1001_s30 + $0x10] sm:$0xf] %v884_v50 }
  0x15   : > { %840 = vmatmul.mubr.msk.f32.gmra.mxu0 %vm216_vm0, %v201_v8  ;;  %852 = vmatmul.mubr.msk.f32.gmra.mxu1 %vm216_vm0, %v209_v9  ;;  %v213_v27 = vld [vmem:[%s926_s22 + $0x78] sm:$0xff]  ;;  %v803_v28 = vpack.c.bf16 %v415_v24, %v415_v24  ;;  %v416_v31 = vld [vmem:[%s941_s25 + $0x30] sm:$0xff]  ;;  %v419_v34 = vld [vmem:[%s941_s25 + $0x48] sm:$0xff]  ;;  %431 = vst [vmem:[%s1001_s30 + $0x14] sm:$0xf] %v884_v50 }
  0x16   : > { %842 = vmatprep.mubr.msk.f32.mxu0 %vm216_vm0, %v202_v10  ;;  %854 = vmatprep.mubr.msk.f32.mxu1 %vm216_vm0, %v210_v11  ;;  %v417_v30 = vld [vmem:[%s941_s25 + $0x38] sm:$0xff]  ;;  %v804_v33 = vpack.c.bf16 %v416_v31, %v416_v31  ;;  %v418_v35 = vld [vmem:[%s941_s25 + $0x40] sm:$0xff]  ;;  %v807_v36 = vpack.c.bf16 %v419_v34, %v419_v34  ;;  %v420_v39 = vld [vmem:[%s941_s25 + $0x50] sm:$0xff]  ;;  %432 = vst [vmem:[%s1001_s30 + $0x18] sm:$0xf] %v884_v50 }
  0x17   : > { %571 = vrot.lane.b32.xlu0 %v798_v15, %s883_s26  ;;  %577 = vrot.lane.b32.xlu1 %v801_v22, %s883_s26  ;;  %v805_v32 = vpack.c.bf16 %v417_v30, %v417_v30  ;;  %v806_v37 = vpack.c.bf16 %v418_v35, %v418_v35  ;;  %v421_v38 = vld [vmem:[%s941_s25 + $0x58] sm:$0xff]  ;;  %v808_v41 = vpack.c.bf16 %v420_v39, %v420_v39  ;;  %v423_v42 = vld [vmem:[%s941_s25 + $0x68] sm:$0xff]  ;;  %v885_v9 = vmov 1065369472  }
  0x18   : > { %v809_v40 = vpack.c.bf16 %v421_v38, %v421_v38  ;;  %v422_v43 = vld [vmem:[%s941_s25 + $0x60] sm:$0xff]  ;;  %v811_v44 = vpack.c.bf16 %v423_v42, %v423_v42  ;;  %v425_v46 = vld [vmem:[%s941_s25 + $0x78] sm:$0xff]  ;;  %v424_v47 = vld [vmem:[%s941_s25 + $0x70] sm:$0xff]  ;;  %433 = vst [vmem:[%s1001_s30 + $0x1c] sm:$0xf] %v884_v50 }
  0x19   : > { %843 = vmatmul.mubr.msk.f32.gmra.mxu0 %vm216_vm0, %v203_v18  ;;  %855 = vmatmul.mubr.msk.f32.gmra.mxu1 %vm216_vm0, %v211_v19  ;;  %v810_v45 = vpack.c.bf16 %v422_v43, %v422_v43  ;;  %v813_v48 = vpack.c.bf16 %v425_v46, %v425_v46  ;;  %v812_v49 = vpack.c.bf16 %v424_v47, %v424_v47 }
  0x1a   : > { %845 = vmatprep.mubr.msk.f32.mxu0 %vm216_vm0, %v204_v20  ;;  %857 = vmatprep.mubr.msk.f32.mxu1 %vm216_vm0, %v212_v21  ;;  %434 = vst [vmem:[%s1001_s30 + $0x20] sm:$0xf] %v884_v50  ;;  %435 = vst [vmem:[%s1001_s30 + $0x24] sm:$0xf] %v884_v50 }
  0x1b   : > { %573 = vrot.lane.b32.xlu0 %v799_v23, %s883_s26  ;;  %581 = vrot.lane.b32.xlu1 %v803_v28, %s883_s26  ;;  %436 = vst [vmem:[%s1001_s30 + $0x28] sm:$0xf] %v884_v50  ;;  %437 = vst [vmem:[%s1001_s30 + $0x2c] sm:$0xf] %v884_v50 }
  0x1c   : > { %438 = vst [vmem:[%s1001_s30 + $0x30] sm:$0xf] %v884_v50  ;;  %439 = vst [vmem:[%s1001_s30 + $0x34] sm:$0xf] %v884_v50 }
  0x1d   : > { %846 = vmatmul.mubr.msk.f32.gmra.mxu0 %vm216_vm0, %v205_v26  ;;  %858 = vmatmul.mubr.msk.f32.gmra.mxu1 %vm216_vm0, %v213_v27  ;;  %440 = vst [vmem:[%s1001_s30 + $0x38] sm:$0xf] %v884_v50  ;;  %441 = vst [vmem:[%s1001_s30 + $0x3c] sm:$0xf] %v884_v50 }
  0x1f   : > { %579 = vrot.lane.b32.xlu0 %v802_v29, %s883_s26  ;;  %585 = vrot.lane.b32.xlu1 %v805_v32, %s883_s26 }
  0x23   : > { %583 = vrot.lane.b32.xlu0 %v804_v33, %s883_s26  ;;  %589 = vrot.lane.b32.xlu1 %v807_v36, %s883_s26 }
  0x27   : > { %587 = vrot.lane.b32.xlu0 %v806_v37, %s883_s26  ;;  %593 = vrot.lane.b32.xlu1 %v809_v40, %s883_s26 }
  0x2b   : > { %591 = vrot.lane.b32.xlu0 %v808_v41, %s883_s26  ;;  %597 = vrot.lane.b32.xlu1 %v811_v44, %s883_s26 }
  0x2f   : > { %595 = vrot.lane.b32.xlu0 %v810_v45, %s883_s26  ;;  %601 = vrot.lane.b32.xlu1 %v813_v48, %s883_s26 }
  0x33   : > { %599 = vrot.lane.b32.xlu0 %v812_v49, %s883_s26 }
  0x85   : > { %v576_v51 = vpop.permute.xlu1 %575 }
  0x89   : > { %v572_v52 = vpop.permute.xlu0 %571  ;;  %v578_v53 = vpop.permute.xlu1 %577 }
  0x8d   : > { %v574_v54 = vpop.permute.xlu0 %573  ;;  %v1019_v55 = vpop.permute.xlu1 %581 }
  0x91   : > { %v1021_v56 = vpop.permute.xlu0 %579  ;;  %v1023_v57 = vpop.permute.xlu1 %585 }
  0x95   : > { %v1025_v58 = vpop.permute.xlu0 %583  ;;  %v590_v59 = vpop.permute.xlu1 %589 }
  0x99   : > { %v588_v60 = vpop.permute.xlu0 %587  ;;  %v594_v1 = vpop.permute.xlu1 %593 }
  0x9d   : > { %v592_v6 = vpop.permute.xlu0 %591  ;;  %v598_v16 = vpop.permute.xlu1 %597 }
  0xa1   : > { %v596_v21 = vpop.permute.xlu0 %595  ;;  %v602_v30 = vpop.permute.xlu1 %601 }
  0xa5   : > { %v600_v35 = vpop.permute.xlu0 %599 }
  0xd1   : > { %v838_v61 = vpop.f32.mrf.mxu0  ;;  %v850_v62 = vpop.f32.mrf.mxu1 }
  0xd2   : > { %v783_v63 = vpack.c.bf16 %v838_v61, %v838_v61  ;;  %v791_v0 = vpack.c.bf16 %v850_v62, %v850_v62 }
  0xd3   : > { %v331_v2 = vpop.f32.mrf.mxu0  ;;  %v371_v3 = vpop.f32.mrf.mxu1 }
  0xd4   : > { %508 = vst.msk [vmem:[%s1001_s30 + $0x4] sm:$0xf] %vm506_vm1, %v783_v63  ;;  %516 = vst.msk [vmem:[%s1001_s30 + $0x24] sm:$0xf] %vm506_vm1, %v791_v0  ;;  %v782_v4 = vpack.c.bf16 %v331_v2, %v331_v2  ;;  %v790_v5 = vpack.c.bf16 %v371_v3, %v371_v3 }
  0xd5   : > { %621 = vst.msk [vmem:[%s1001_s30 + $0x4] sm:$0xf] %vm619_vm2, %v574_v54  ;;  %v841_v7 = vpop.f32.mrf.mxu0  ;;  %v853_v8 = vpop.f32.mrf.mxu1  ;;  %629 = vst.msk [vmem:[%s1001_s30 + $0x24] sm:$0xf] %vm619_vm2, %v590_v59 }
  0xd6   : > { %638 = vst.msk [vmem:[%s1001_s30 + $0x4] sm:$0xf] %vm636_vm3, %v885_v9  ;;  %v785_v10 = vpack.c.bf16 %v841_v7, %v841_v7  ;;  %v793_v11 = vpack.c.bf16 %v853_v8, %v853_v8  ;;  %646 = vst.msk [vmem:[%s1001_s30 + $0x24] sm:$0xf] %vm636_vm3, %v885_v9 }
  0xd7   : > { %507 = vst.msk [vmem:[%s1001_s30] sm:$0xf] %vm506_vm1, %v782_v4  ;;  %515 = vst.msk [vmem:[%s1001_s30 + $0x20] sm:$0xf] %vm506_vm1, %v790_v5  ;;  %v341_v12 = vpop.f32.mrf.mxu0  ;;  %v381_v13 = vpop.f32.mrf.mxu1 }
  0xd8   : > { %620 = vst.msk [vmem:[%s1001_s30] sm:$0xf] %vm619_vm2, %v572_v52  ;;  %628 = vst.msk [vmem:[%s1001_s30 + $0x20] sm:$0xf] %vm619_vm2, %v588_v60  ;;  %v784_v14 = vpack.c.bf16 %v341_v12, %v341_v12  ;;  %v792_v15 = vpack.c.bf16 %v381_v13, %v381_v13 }
  0xd9   : > { %637 = vst.msk [vmem:[%s1001_s30] sm:$0xf] %vm636_vm3, %v885_v9  ;;  %645 = vst.msk [vmem:[%s1001_s30 + $0x20] sm:$0xf] %vm636_vm3, %v885_v9  ;;  %v844_v17 = vpop.f32.mrf.mxu0  ;;  %v856_v18 = vpop.f32.mrf.mxu1 }
  0xda   : > { %510 = vst.msk [vmem:[%s1001_s30 + $0xc] sm:$0xf] %vm506_vm1, %v785_v10  ;;  %518 = vst.msk [vmem:[%s1001_s30 + $0x2c] sm:$0xf] %vm506_vm1, %v793_v11  ;;  %v787_v19 = vpack.c.bf16 %v844_v17, %v844_v17  ;;  %v795_v20 = vpack.c.bf16 %v856_v18, %v856_v18 }
  0xdb   : > { %623 = vst.msk [vmem:[%s1001_s30 + $0xc] sm:$0xf] %vm619_vm2, %v578_v53  ;;  %631 = vst.msk [vmem:[%s1001_s30 + $0x2c] sm:$0xf] %vm619_vm2, %v594_v1  ;;  %v351_v22 = vpop.f32.mrf.mxu0  ;;  %v391_v23 = vpop.f32.mrf.mxu1 }
  0xdc   : > { %640 = vst.msk [vmem:[%s1001_s30 + $0xc] sm:$0xf] %vm636_vm3, %v885_v9  ;;  %648 = vst.msk [vmem:[%s1001_s30 + $0x2c] sm:$0xf] %vm636_vm3, %v885_v9  ;;  %v786_v24 = vpack.c.bf16 %v351_v22, %v351_v22  ;;  %v794_v25 = vpack.c.bf16 %v391_v23, %v391_v23 }
  0xdd   : > { %509 = vst.msk [vmem:[%s1001_s30 + $0x8] sm:$0xf] %vm506_vm1, %v784_v14  ;;  %517 = vst.msk [vmem:[%s1001_s30 + $0x28] sm:$0xf] %vm506_vm1, %v792_v15  ;;  %v847_v26 = vpop.f32.mrf.mxu0  ;;  %v859_v27 = vpop.f32.mrf.mxu1 }
  0xde   : > { %622 = vst.msk [vmem:[%s1001_s30 + $0x8] sm:$0xf] %vm619_vm2, %v576_v51  ;;  %630 = vst.msk [vmem:[%s1001_s30 + $0x28] sm:$0xf] %vm619_vm2, %v592_v6  ;;  %v789_v28 = vpack.c.bf16 %v847_v26, %v847_v26  ;;  %v797_v29 = vpack.c.bf16 %v859_v27, %v859_v27 }
  0xdf   : > { %639 = vst.msk [vmem:[%s1001_s30 + $0x8] sm:$0xf] %vm636_vm3, %v885_v9  ;;  %647 = vst.msk [vmem:[%s1001_s30 + $0x28] sm:$0xf] %vm636_vm3, %v885_v9  ;;  %v361_v31 = vpop.f32.mrf.mxu0  ;;  %v401_v32 = vpop.f32.mrf.mxu1 }
  0xe0   : > { %512 = vst.msk [vmem:[%s1001_s30 + $0x14] sm:$0xf] %vm506_vm1, %v787_v19  ;;  %520 = vst.msk [vmem:[%s1001_s30 + $0x34] sm:$0xf] %vm506_vm1, %v795_v20  ;;  %v788_v33 = vpack.c.bf16 %v361_v31, %v361_v31  ;;  %v796_v34 = vpack.c.bf16 %v401_v32, %v401_v32 }
  0xe1   : > { %625 = vst.msk [vmem:[%s1001_s30 + $0x14] sm:$0xf] %vm619_vm2, %v1019_v55  ;;  %633 = vst.msk [vmem:[%s1001_s30 + $0x34] sm:$0xf] %vm619_vm2, %v598_v16 }
  0xe2   : > { %642 = vst.msk [vmem:[%s1001_s30 + $0x14] sm:$0xf] %vm636_vm3, %v885_v9  ;;  %650 = vst.msk [vmem:[%s1001_s30 + $0x34] sm:$0xf] %vm636_vm3, %v885_v9 }
  0xe3   : > { %511 = vst.msk [vmem:[%s1001_s30 + $0x10] sm:$0xf] %vm506_vm1, %v786_v24  ;;  %519 = vst.msk [vmem:[%s1001_s30 + $0x30] sm:$0xf] %vm506_vm1, %v794_v25 }
  0xe4   : > { %624 = vst.msk [vmem:[%s1001_s30 + $0x10] sm:$0xf] %vm619_vm2, %v1021_v56  ;;  %632 = vst.msk [vmem:[%s1001_s30 + $0x30] sm:$0xf] %vm619_vm2, %v596_v21 }
  0xe5   : > { %641 = vst.msk [vmem:[%s1001_s30 + $0x10] sm:$0xf] %vm636_vm3, %v885_v9  ;;  %649 = vst.msk [vmem:[%s1001_s30 + $0x30] sm:$0xf] %vm636_vm3, %v885_v9 }
  0xe6   : > { %514 = vst.msk [vmem:[%s1001_s30 + $0x1c] sm:$0xf] %vm506_vm1, %v789_v28  ;;  %522 = vst.msk [vmem:[%s1001_s30 + $0x3c] sm:$0xf] %vm506_vm1, %v797_v29 }
  0xe7   : > { %627 = vst.msk [vmem:[%s1001_s30 + $0x1c] sm:$0xf] %vm619_vm2, %v1023_v57  ;;  %635 = vst.msk [vmem:[%s1001_s30 + $0x3c] sm:$0xf] %vm619_vm2, %v602_v30 }
  0xe8   : > { %644 = vst.msk [vmem:[%s1001_s30 + $0x1c] sm:$0xf] %vm636_vm3, %v885_v9  ;;  %652 = vst.msk [vmem:[%s1001_s30 + $0x3c] sm:$0xf] %vm636_vm3, %v885_v9 }
  0xe9   : > { %513 = vst.msk [vmem:[%s1001_s30 + $0x18] sm:$0xf] %vm506_vm1, %v788_v33  ;;  %521 = vst.msk [vmem:[%s1001_s30 + $0x38] sm:$0xf] %vm506_vm1, %v796_v34 }
  0xea   : > { %626 = vst.msk [vmem:[%s1001_s30 + $0x18] sm:$0xf] %vm619_vm2, %v1025_v58  ;;  %634 = vst.msk [vmem:[%s1001_s30 + $0x38] sm:$0xf] %vm619_vm2, %v600_v35 }
  0xeb   : > { %643 = vst.msk [vmem:[%s1001_s30 + $0x18] sm:$0xf] %vm636_vm3, %v885_v9  ;;  %651 = vst.msk [vmem:[%s1001_s30 + $0x38] sm:$0xf] %vm636_vm3, %v885_v9 }
  0xec PF: > { %s13_s12 = sadd.s32 1, %s881_s12  }
  0xed   : > { %p10_p4 = scmp.ge.s32.totalorder %s13_s12, 4  }
  0xef   :  { %12 = sbr.rel (!%p10_p4) target bundleno = 1 (0x1), region = 65 }

// kernel: net_estimator_forward.3
= control target key start
LH: loop header
LB: loop body
LE: loop exit
PB: predicated region body
PF: predicated region fallthrough
CT: control target
= control target key end

     0   :  { %s3019_s21 = smov 0   ;;  %s3021_s22 = smov 0   ;;  %s3778_s0 = inlined_call_operand.vmem [shape: bf16[256,256], index: 0, kind: input, shape index: {}]   ;;  %s3779_s1 = inlined_call_operand.vmem [shape: bf16[256,128], index: 1, kind: input, shape index: {}]   ;;  %s3780_s2 = inlined_call_operand.vmem [shape: f32[256,1], index: 2, kind: input, shape index: {}]   ;;  %s3781_s3 = inlined_call_operand.vmem [shape: f32[1,32], index: 3, kind: input, shape index: {}]   ;;  %s3782_s4 = inlined_call_operand.vmem [shape: f32[32,96], index: 4, kind: input, shape index: {}]   ;;  %s3783_s5 = inlined_call_operand.vmem [shape: f32[1,96], index: 5, kind: input, shape index: {}]   ;;  %s3784_s6 = inlined_call_operand.vmem [shape: f32[1,96], index: 6, kind: input, shape index: {}]   ;;  %s3785_s7 = inlined_call_operand.vmem [shape: f32[1,96], index: 7, kind: input, shape index: {}]   ;;  %s3786_s8 = inlined_call_operand.vmem [shape: f32[96,96], index: 8, kind: input, shape index: {}]   ;;  %s3787_s9 = inlined_call_operand.vmem [shape: f32[1,96], index: 9, kind: input, shape index: {}]   ;;  %s3788_s10 = inlined_call_operand.vmem [shape: f32[96,3], index: 10, kind: input, shape index: {}]   ;;  %s3789_s11 = inlined_call_operand.vmem [shape: f32[1,3], index: 11, kind: input, shape index: {}]   ;;  %s3790_s12 = inlined_call_operand.vmem [shape: f32[256,128], index: 12, kind: output, shape index: {}]  }
   0x1   :  { %s3023_s23 = smov 0  }
   0x2 LB: > { %s34_s24 = sadd.s32 1, %s2942_s22  ;;  %p2411_p0 = scmp.ge.s32.totalorder %s2946_s23, 1  ;;  %s2946_s23 = sphi %s3023_s23, %s22_s23   ;;  %s2942_s22 = sphi %s3021_s22, %s3792_s22   ;;  %s2938_s21 = sphi %s3019_s21, %s3791_s21  }
   0x3   : > { %p36_p1 = scmp.ge.s32.totalorder %s34_s24, 2  ;;  %p405_p2 = scmp.lt.s32.totalorder %s2946_s23, 3 }
   0x5   : > { %s3794_s24 = smov (%p36_p1, %s34_s24), 0  ;;  %p406_p3 = pnand %p2411_p0, %p405_p2 }
   0x6   : > { %s2412_s27 = sshll.u32 (!%p406_p3), %s2938_s21, 4  ;;  %s2950_s16 = smov (!%p406_p3), 127  }
   0x7   : > { %409 = sbr.rel (%p406_p3) target bundleno = 1129 (0x469), region = 68  ;;  %p464_p4 = scmp.lt.s32.totalorder (!%p406_p3), %s2412_s27, 31 }
   0x8   : > { %s2952_s17 = smov (!%p406_p3), 3   ;;  %s2953_s29 = smov (!%p406_p3), 32  }
   0xc   : > { %v2820_v0 = vld [vmem:[%s3779_s1 + $0x78] sm:$0xff]   ;;  %v2822_v2 = vld [vmem:[%s3779_s1 + $0x70] sm:$0xff]   ;;  %v2824_v4 = vld [vmem:[%s3779_s1 + $0x68] sm:$0xff]   ;;  %s3796_s27 = smov (!%p464_p4, %s2412_s27), 31  ;;  %v2948_v35 = vmov 0.0   ;;  %v2949_v37 = vmov 0  }
   0xd   : > { %v2821_v1 = vld [vmem:[%s3779_s1 + $0x38] sm:$0xff]   ;;  %2508 = vmatprep.subr.bf16.mxu0 %v2820_v0  ;;  %v2823_v3 = vld [vmem:[%s3779_s1 + $0x30] sm:$0xff]   ;;  %v2825_v5 = vld [vmem:[%s3779_s1 + $0x28] sm:$0xff]   ;;  %s3061_s28 = sshll.u32 %s3796_s27, 3  ;;  %2815 = vset.pattern.permute.xlu1 %v2949_v37  ;;  %vm1175_vm0 = vcmask 261120   ;;  %vm1546_vm1 = vcmask 785408  }
   0xe   : > { %2509 = vmatpush3.bf16.msra.mxu0 %v2821_v1  ;;  %v2826_v6 = vld [vmem:[%s3779_s1 + $0x60] sm:$0xff]   ;;  %v2828_v8 = vld [vmem:[%s3779_s1 + $0x58] sm:$0xff]   ;;  %s3070_s15 = scalar_lea.vmem %s3778_s0, %s3061_s28  ;;  %v2830_v10 = vld [vmem:[%s3779_s1 + $0x50] sm:$0xff]   ;;  %s3116_s20 = scalar_lea.vmem %s3790_s12, %s3061_s28  ;;  %2814 = vset.pattern.permute.xlu0 %v2949_v37  ;;  %vm2128_vm2 = vcmask 269568   ;;  %vm2145_vm3 = vcmask 277768   ;;  %vm2226_vm4 = vcmask 285968  }
   0xf   : > { %2510 = vmatprep.subr.bf16.mxu0 %v2822_v2  ;;  %v2827_v7 = vld [vmem:[%s3779_s1 + $0x20] sm:$0xff]   ;;  %v2829_v9 = vld [vmem:[%s3779_s1 + $0x18] sm:$0xff]   ;;  %v2831_v12 = vld [vmem:[%s3779_s1 + $0x10] sm:$0xff]   ;;  %1969 = vst [vmem:[%s3116_s20 + $0x8] sm:$0xff] %v2948_v35  ;;  %s3294_s18 = scalar_lea.vmem %s3780_s2, %s3061_s28  ;;  %vm2291_vm5 = vcmask 294168  }
  0x10   : > { %v2838_v11 = vld [vmem:[%s3070_s15 + $0x4] ss:$8 sps:$4 sm:$0xff]   ;;  %v2836_v17 = vld [vmem:[%s3070_s15] ss:$8 sps:$4 sm:$0xff]   ;;  %v2839_v18 = vld [vmem:[%s3070_s15 + $0x14] ss:$8 sps:$4 sm:$0xff]   ;;  %1968 = vst [vmem:[%s3116_s20] sm:$0xff] %v2948_v35 }
  0x11   : > { %785 = vmatprep.mubr.bf16.mxu0 %v2838_v11  ;;  %v2832_v13 = vld [vmem:[%s3779_s1 + $0x48] sm:$0xff]   ;;  %v2834_v15 = vld [vmem:[%s3779_s1 + $0x40] sm:$0xff]   ;;  %v2841_v19 = vld [vmem:[%s3070_s15 + $0x10] ss:$8 sps:$4 sm:$0xff]   ;;  %1970 = vst [vmem:[%s3116_s20 + $0x10] sm:$0xff] %v2948_v35 }
  0x12   : > { %2511 = vmatpush3.bf16.msra.mxu0 %v2823_v3  ;;  %v2833_v14 = vld [vmem:[%s3779_s1 + $0x8] sm:$0xff]   ;;  %v2835_v16 = vld [vmem:[%s3779_s1] sm:$0xff]   ;;  %v2845_v22 = vld [vmem:[%s3070_s15 + $0x34] ss:$8 sps:$4 sm:$0xff]   ;;  %1971 = vst [vmem:[%s3116_s20 + $0x18] sm:$0xff] %v2948_v35 }
  0x13   : > { %2512 = vmatprep.subr.bf16.mxu0 %v2824_v4  ;;  %v2842_v20 = vld [vmem:[%s3070_s15 + $0x24] ss:$8 sps:$4 sm:$0xff]   ;;  %v2844_v21 = vld [vmem:[%s3070_s15 + $0x20] ss:$8 sps:$4 sm:$0xff]   ;;  %v2847_v23 = vld [vmem:[%s3070_s15 + $0x30] ss:$8 sps:$4 sm:$0xff]  }
  0x14   : > { %v2848_v24 = vld [vmem:[%s3070_s15 + $0x44] ss:$8 sps:$4 sm:$0xff]   ;;  %v2850_v25 = vld [vmem:[%s3070_s15 + $0x40] ss:$8 sps:$4 sm:$0xff]   ;;  %v2851_v26 = vld [vmem:[%s3070_s15 + $0x54] ss:$8 sps:$4 sm:$0xff]  }
  0x15   : > { %v2853_v27 = vld [vmem:[%s3070_s15 + $0x50] ss:$8 sps:$4 sm:$0xff]   ;;  %v2854_v28 = vld [vmem:[%s3070_s15 + $0x64] ss:$8 sps:$4 sm:$0xff]   ;;  %v2856_v29 = vld [vmem:[%s3070_s15 + $0x60] ss:$8 sps:$4 sm:$0xff]  }
  0x16   : > { %2513 = vmatpush3.bf16.msra.mxu0 %v2825_v5  ;;  %v2857_v30 = vld [vmem:[%s3070_s15 + $0x74] ss:$8 sps:$4 sm:$0xff]   ;;  %v2859_v31 = vld [vmem:[%s3070_s15 + $0x70] ss:$8 sps:$4 sm:$0xff]   ;;  %v1069_v34 = vld [vmem:[%s3782_s4 + $0x8] sm:$0xff]  ;;  %1972 = vst [vmem:[%s3116_s20 + $0x20] sm:$0xff] %v2948_v35 }
  0x17   : > { %2514 = vmatprep.subr.bf16.mxu0 %v2826_v6  ;;  %v1071_v32 = vld [vmem:[%s3782_s4 + $0x18] sm:$0xff]  ;;  %v1070_v33 = vld [vmem:[%s3782_s4 + $0x10] sm:$0xff]  ;;  %1973 = vst [vmem:[%s3116_s20 + $0x28] sm:$0xff] %v2948_v35  ;;  %1974 = vst [vmem:[%s3116_s20 + $0x30] sm:$0xff] %v2948_v35 }
  0x18   : > { %2776 = vmatprep.subr.mxu1 %v1071_v32  ;;  %1975 = vst [vmem:[%s3116_s20 + $0x38] sm:$0xff] %v2948_v35  ;;  %1976 = vst [vmem:[%s3116_s20 + $0x40] sm:$0xff] %v2948_v35  ;;  %v1068_v36 = vld [vmem:[%s3782_s4] sm:$0xff] }
  0x19   : > { %2780 = vmatpush3.msra.mxu1 %v1071_v32  ;;  %1977 = vst [vmem:[%s3116_s20 + $0x48] sm:$0xff] %v2948_v35  ;;  %1978 = vst [vmem:[%s3116_s20 + $0x50] sm:$0xff] %v2948_v35  ;;  %v3148_v40 = vld [vmem:[%s3781_s3] ss:$0 sm:$0xff] }
  0x1a   : > { %2515 = vmatpush3.bf16.msra.mxu0 %v2827_v7  ;;  %2777 = vmatprep.subr.mxu1 %v1070_v33  ;;  %1979 = vst [vmem:[%s3116_s20 + $0x58] sm:$0xff] %v2948_v35  ;;  %1980 = vst [vmem:[%s3116_s20 + $0x60] sm:$0xff] %v2948_v35 }
  0x1b   : > { %2516 = vmatprep.subr.bf16.mxu0 %v2828_v8  ;;  %2781 = vmatpush3.msra.mxu1 %v1070_v33  ;;  %1981 = vst [vmem:[%s3116_s20 + $0x68] sm:$0xff] %v2948_v35  ;;  %1982 = vst [vmem:[%s3116_s20 + $0x70] sm:$0xff] %v2948_v35 }
  0x1c   : > { %1983 = vst [vmem:[%s3116_s20 + $0x78] sm:$0xff] %v2948_v35  ;;  %2778 = vmatprep.subr.mxu1 %v1069_v34 }
  0x1d   : > { %2782 = vmatpush3.msra.mxu1 %v1069_v34 }
  0x1e   : > { %2517 = vmatpush3.bf16.msra.mxu0 %v2829_v9  ;;  %2779 = vmatprep.subr.mxu1 %v1068_v36 }
  0x1f   : > { %2518 = vmatprep.subr.bf16.mxu0 %v2830_v10  ;;  %2783 = vmatpush3.msra.mxu1 %v1068_v36 }
  0x22   : > { %2519 = vmatpush3.bf16.msra.mxu0 %v2831_v12 }
  0x23   : > { %2520 = vmatprep.subr.bf16.mxu0 %v2832_v13 }
  0x26   : > { %2521 = vmatpush3.bf16.msra.mxu0 %v2833_v14 }
  0x27   : > { %2522 = vmatprep.subr.bf16.mxu0 %v2834_v15 }
  0x2a   : > { %2523 = vmatpush3.bf16.msra.mxu0 %v2835_v16 }
  0x2b   : > { %2648 = vmatprep.subr.mxu0 %v1071_v32 }
  0x2d   : > { %786 = vmatmul.mubr.bf16.vlgmr.msra.gmra.mxu0 %v2836_v17 }
  0x2e   : > { %793 = vmatprep.mubr.bf16.mxu0 %v2839_v18  ;;  %2649 = vmatpush3.msra.mxu0 %v1071_v32 }
  0x2f   : > { %2650 = vmatprep.subr.mxu0 %v1070_v33 }
  0x30   : > { %2651 = vmatpush3.msra.mxu0 %v1070_v33 }
  0x31   : > { %2652 = vmatprep.subr.mxu0 %v1069_v34 }
  0x32   : > { %2653 = vmatpush3.msra.mxu0 %v1069_v34 }
  0x33   : > { %2654 = vmatprep.subr.mxu0 %v1068_v36 }
  0x34   : > { %2655 = vmatpush3.msra.mxu0 %v1068_v36 }
  0x35   : > { %794 = vmatmul.mubr.bf16.gmra.mxu0 %v2841_v19 }
  0x36   : > { %801 = vmatprep.mubr.bf16.mxu0 %v2842_v20 }
  0x3d   : > { %802 = vmatmul.mubr.bf16.gmra.mxu0 %v2844_v21 }
  0x3e   : > { %809 = vmatprep.mubr.bf16.mxu0 %v2845_v22 }
  0x45   : > { %810 = vmatmul.mubr.bf16.gmra.mxu0 %v2847_v23 }
  0x46   : > { %817 = vmatprep.mubr.bf16.mxu0 %v2848_v24 }
  0x4d   : > { %818 = vmatmul.mubr.bf16.gmra.mxu0 %v2850_v25 }
  0x4e   : > { %825 = vmatprep.mubr.bf16.mxu0 %v2851_v26 }
  0x55   : > { %826 = vmatmul.mubr.bf16.gmra.mxu0 %v2853_v27 }
  0x56   : > { %833 = vmatprep.mubr.bf16.mxu0 %v2854_v28 }
  0x5d   : > { %834 = vmatmul.mubr.bf16.gmra.mxu0 %v2856_v29 }
  0x5e   : > { %841 = vmatprep.mubr.bf16.mxu0 %v2857_v30 }
  0x65   : > { %842 = vmatmul.mubr.bf16.gmra.mxu0 %v2859_v31 }
  0xed   : > { %v2524_v38 = vpop.f32.mrf.mxu0 }
  0xef   : > { %v2525_v39 = vpop.f32.mrf.mxu0 }
  0xf0   : > { %v3150_v41 = vadd.f32 %v2525_v39, %v2524_v38 }
  0xf1   : > { %v2527_v42 = vpop.f32.mrf.mxu0 }
  0xf2   : > { %v924_v43 = vadd.f32 %v3150_v41, %v3148_v40  ;;  %v956_v44 = vmax.f32 %v3150_v41, 1e-12 }
  0xf3   : > { %v2528_v45 = vpop.f32.mrf.mxu0 }
  0xf4   : > { %v940_v46 = vmax.f32 %v924_v43, 0.0  ;;  %2860 = vrcp.f32 %v956_v44  ;;  %v3155_v47 = vadd.f32 %v2528_v45, %v2527_v42 }
  0xf5   : > { %v2530_v48 = vpop.f32.mrf.mxu0 }
  0xf6   : > { %v925_v49 = vadd.f32 %v3155_v47, %v3148_v40  ;;  %v957_v50 = vmax.f32 %v3155_v47, 1e-12  ;;  %2656 = vmatprep.mubr.msk.f32.mxu0 %vm1175_vm0, %v940_v46  ;;  %1984 = vst.msk [vmem:[%s3116_s20] sm:$0xff] %vm1175_vm0, %v940_v46 }
  0xf7   : > { %v2531_v51 = vpop.f32.mrf.mxu0 }
  0xf8   : > { %v941_v52 = vmax.f32 %v925_v49, 0.0  ;;  %2862 = vrcp.f32 %v957_v50  ;;  %v3163_v53 = vadd.f32 %v2531_v51, %v2530_v48 }
  0xf9   : > { %v2533_v54 = vpop.f32.mrf.mxu0 }
  0xfa   : > { %v958_v55 = vmax.f32 %v3163_v53, 1e-12  ;;  %2657 = vmatmul.mubr.msk.f32.vlgmr.msra.gmra.mxu0 %vm1175_vm0, %v941_v52  ;;  %v926_v56 = vadd.f32 %v3163_v53, %v3148_v40  ;;  %1985 = vst.msk [vmem:[%s3116_s20 + $0x8] sm:$0xff] %vm1175_vm0, %v941_v52 }
  0xfb   : > { %v2534_v57 = vpop.f32.mrf.mxu0 }
  0xfc   : > { %2864 = vrcp.f32 %v958_v55  ;;  %v3171_v58 = vadd.f32 %v2534_v57, %v2533_v54  ;;  %v942_v59 = vmax.f32 %v926_v56, 0.0 }
  0xfd   : > { %v2536_v60 = vpop.f32.mrf.mxu0 }
  0xfe   : > { %v927_v61 = vadd.f32 %v3171_v58, %v3148_v40  ;;  %v959_v62 = vmax.f32 %v3171_v58, 1e-12  ;;  %2659 = vmatprep.mubr.msk.f32.mxu1 %vm1175_vm0, %v942_v59  ;;  %1986 = vst.msk [vmem:[%s3116_s20 + $0x10] sm:$0xff] %vm1175_vm0, %v942_v59 }
  0xff   : > { %v2537_v63 = vpop.f32.mrf.mxu0 }
 0x100   : > { %v943_v0 = vmax.f32 %v927_v61, 0.0  ;;  %2866 = vrcp.f32 %v959_v62  ;;  %v3179_v1 = vadd.f32 %v2537_v63, %v2536_v60 }
 0x101   : > { %v2861_v2 = vpop.eup %2860  ;;  %v2539_v3 = vpop.f32.mrf.mxu0 }
 0x102   : > { %v928_v4 = vadd.f32 %v3179_v1, %v3148_v40  ;;  %v960_v5 = vmax.f32 %v3179_v1, 1e-12  ;;  %2660 = vmatmul.mubr.msk.f32.vlgmr.msra.gmra.mxu1 %vm1175_vm0, %v943_v0  ;;  %1004 = vrot.lane.b32.xlu0 %v2861_v2, %s2950_s16  ;;  %1987 = vst.msk [vmem:[%s3116_s20 + $0x18] sm:$0xff] %vm1175_vm0, %v943_v0 }
 0x103   : > { %v2540_v6 = vpop.f32.mrf.mxu0 }
 0x104   : > { %v944_v7 = vmax.f32 %v928_v4, 0.0  ;;  %2868 = vrcp.f32 %v960_v5  ;;  %v3188_v8 = vadd.f32 %v2540_v6, %v2539_v3 }
 0x105   : > { %v2863_v9 = vpop.eup %2862  ;;  %v2542_v10 = vpop.f32.mrf.mxu0 }
 0x106   : > { %v929_v11 = vadd.f32 %v3188_v8, %v3148_v40  ;;  %v961_v12 = vmax.f32 %v3188_v8, 1e-12  ;;  %2662 = vmatprep.mubr.msk.f32.mxu1 %vm1175_vm0, %v944_v7  ;;  %1006 = vrot.lane.b32.xlu0 %v2863_v9, %s2950_s16  ;;  %1988 = vst.msk [vmem:[%s3116_s20 + $0x20] sm:$0xff] %vm1175_vm0, %v944_v7 }
 0x107   : > { %v2543_v13 = vpop.f32.mrf.mxu0 }
 0x108   : > { %v945_v14 = vmax.f32 %v929_v11, 0.0  ;;  %2870 = vrcp.f32 %v961_v12  ;;  %v3197_v15 = vadd.f32 %v2543_v13, %v2542_v10 }
 0x109   : > { %v2865_v16 = vpop.eup %2864  ;;  %v2545_v17 = vpop.f32.mrf.mxu0 }
 0x10a   : > { %v930_v18 = vadd.f32 %v3197_v15, %v3148_v40  ;;  %v962_v19 = vmax.f32 %v3197_v15, 1e-12  ;;  %1008 = vrot.lane.b32.xlu1 %v2865_v16, %s2950_s16  ;;  %2663 = vmatmul.mubr.msk.f32.gmra.mxu1 %vm1175_vm0, %v945_v14  ;;  %1989 = vst.msk [vmem:[%s3116_s20 + $0x28] sm:$0xff] %vm1175_vm0, %v945_v14 }
 0x10b   : > { %v2546_v20 = vpop.f32.mrf.mxu0 }
 0x10c   : > { %v946_v21 = vmax.f32 %v930_v18, 0.0  ;;  %2872 = vrcp.f32 %v962_v19  ;;  %v3206_v22 = vadd.f32 %v2546_v20, %v2545_v17 }
 0x10d   : > { %v2867_v23 = vpop.eup %2866  ;;  %v2548_v24 = vpop.f32.mrf.mxu0 }
 0x10e   : > { %v931_v25 = vadd.f32 %v3206_v22, %v3148_v40  ;;  %v963_v26 = vmax.f32 %v3206_v22, 1e-12  ;;  %1010 = vrot.lane.b32.xlu1 %v2867_v23, %s2950_s16  ;;  %2665 = vmatprep.mubr.msk.f32.mxu1 %vm1175_vm0, %v946_v21  ;;  %1990 = vst.msk [vmem:[%s3116_s20 + $0x30] sm:$0xff] %vm1175_vm0, %v946_v21 }
 0x10f   : > { %v2549_v27 = vpop.f32.mrf.mxu0 }
 0x110   : > { %v947_v28 = vmax.f32 %v931_v25, 0.0  ;;  %2874 = vrcp.f32 %v963_v26  ;;  %v3215_v29 = vadd.f32 %v2549_v27, %v2548_v24 }
 0x111   : > { %v2869_v30 = vpop.eup %2868  ;;  %v2551_v31 = vpop.f32.mrf.mxu0 }
 0x112   : > { %v932_v32 = vadd.f32 %v3215_v29, %v3148_v40  ;;  %v964_v33 = vmax.f32 %v3215_v29, 1e-12  ;;  %2666 = vmatmul.mubr.msk.f32.gmra.mxu1 %vm1175_vm0, %v947_v28  ;;  %1012 = vrot.lane.b32.xlu0 %v2869_v30, %s2950_s16  ;;  %1991 = vst.msk [vmem:[%s3116_s20 + $0x38] sm:$0xff] %vm1175_vm0, %v947_v28  ;;  %v902_v30 = vld [vmem:[%s3294_s18 + $0x8] sm:$0xff] }
 0x113   : > { %v2552_v34 = vpop.f32.mrf.mxu0 }
 0x114   : > { %v948_v35 = vmax.f32 %v932_v32, 0.0  ;;  %2876 = vrcp.f32 %v964_v33  ;;  %v3224_v36 = vadd.f32 %v2552_v34, %v2551_v31  ;;  %v903_v33 = vld [vmem:[%s3294_s18 + $0x10] sm:$0xff]  ;;  %v901_v34 = vld [vmem:[%s3294_s18] sm:$0xff] }
 0x115   : > { %v2871_v38 = vpop.eup %2870  ;;  %v2554_v39 = vpop.f32.mrf.mxu0 }
 0x116   : > { %v933_v42 = vadd.f32 %v3224_v36, %v3148_v40  ;;  %v965_v43 = vmax.f32 %v3224_v36, 1e-12  ;;  %1014 = vrot.lane.b32.xlu1 %v2871_v38, %s2950_s16  ;;  %2668 = vmatprep.mubr.msk.f32.mxu1 %vm1175_vm0, %v948_v35  ;;  %1992 = vst.msk [vmem:[%s3116_s20 + $0x40] sm:$0xff] %vm1175_vm0, %v948_v35  ;;  %v904_v35 = vld [vmem:[%s3294_s18 + $0x18] sm:$0xff]  ;;  %v905_v38 = vld [vmem:[%s3294_s18 + $0x20] sm:$0xff] }
 0x117   : > { %v2555_v44 = vpop.f32.mrf.mxu0 }
 0x118   : > { %v949_v45 = vmax.f32 %v933_v42, 0.0  ;;  %2878 = vrcp.f32 %v965_v43  ;;  %v3233_v46 = vadd.f32 %v2555_v44, %v2554_v39  ;;  %v906_v39 = vld [vmem:[%s3294_s18 + $0x28] sm:$0xff]  ;;  %v909_v42 = vld [vmem:[%s3294_s18 + $0x40] sm:$0xff]  ;;  %v907_v43 = vld [vmem:[%s3294_s18 + $0x30] sm:$0xff] }
 0x119   : > { %v2873_v48 = vpop.eup %2872  ;;  %v2557_v49 = vpop.f32.mrf.mxu0  ;;  %v913_v44 = vld [vmem:[%s3294_s18 + $0x60] sm:$0xff] }
 0x11a   : > { %v934_v50 = vadd.f32 %v3233_v46, %v3148_v40  ;;  %v966_v51 = vmax.f32 %v3233_v46, 1e-12  ;;  %2669 = vmatmul.mubr.msk.f32.gmra.mxu1 %vm1175_vm0, %v949_v45  ;;  %1016 = vrot.lane.b32.xlu0 %v2873_v48, %s2950_s16  ;;  %1993 = vst.msk [vmem:[%s3116_s20 + $0x48] sm:$0xff] %vm1175_vm0, %v949_v45  ;;  %v2951_v48 = vmov 32  }
 0x11b   : > { %v2558_v52 = vpop.f32.mrf.mxu0 }
 0x11c   : > { %v950_v54 = vmax.f32 %v934_v50, 0.0  ;;  %2880 = vrcp.f32 %v966_v51  ;;  %v3242_v55 = vadd.f32 %v2558_v52, %v2557_v49  ;;  %v908_v49 = vld [vmem:[%s3294_s18 + $0x38] sm:$0xff]  ;;  %v910_v50 = vld [vmem:[%s3294_s18 + $0x48] sm:$0xff]  ;;  %v911_v51 = vld [vmem:[%s3294_s18 + $0x50] sm:$0xff] }
 0x11d   : > { %v2875_v56 = vpop.eup %2874  ;;  %v2560_v57 = vpop.f32.mrf.mxu0  ;;  %v912_v52 = vld [vmem:[%s3294_s18 + $0x58] sm:$0xff] }
 0x11e   : > { %v935_v59 = vadd.f32 %v3242_v55, %v3148_v40  ;;  %v967_v60 = vmax.f32 %v3242_v55, 1e-12  ;;  %1018 = vrot.lane.b32.xlu1 %v2875_v56, %s2950_s16  ;;  %2671 = vmatprep.mubr.msk.f32.mxu1 %vm1175_vm0, %v950_v54  ;;  %1994 = vst.msk [vmem:[%s3116_s20 + $0x50] sm:$0xff] %vm1175_vm0, %v950_v54  ;;  %v914_v54 = vld [vmem:[%s3294_s18 + $0x68] sm:$0xff]  ;;  %v915_v56 = vld [vmem:[%s3294_s18 + $0x70] sm:$0xff] }
 0x11f   : > { %v2561_v61 = vpop.f32.mrf.mxu0 }
 0x120   : > { %v951_v62 = vmax.f32 %v935_v59, 0.0  ;;  %2882 = vrcp.f32 %v967_v60  ;;  %v3251_v63 = vadd.f32 %v2561_v61, %v2560_v57  ;;  %v1538_v57 = vld [vmem:[%s3786_s8 + $0x58] sm:$0xff]  ;;  %v1537_v59 = vld [vmem:[%s3786_s8 + $0x50] sm:$0xff]  ;;  %v1536_v60 = vld [vmem:[%s3786_s8 + $0x48] sm:$0xff] }
 0x121   : > { %v2877_v0 = vpop.eup %2876  ;;  %v2563_v2 = vpop.f32.mrf.mxu0  ;;  %2680 = vmatprep.subr.mxu1 %v1538_v57  ;;  %v1535_v61 = vld [vmem:[%s3786_s8 + $0x40] sm:$0xff] }
 0x122   : > { %v936_v3 = vadd.f32 %v3251_v63, %v3148_v40  ;;  %v968_v4 = vmax.f32 %v3251_v63, 1e-12  ;;  %2672 = vmatmul.mubr.msk.f32.gmra.mxu1 %vm1175_vm0, %v951_v62  ;;  %1020 = vrot.lane.b32.xlu0 %v2877_v0, %s2950_s16  ;;  %1995 = vst.msk [vmem:[%s3116_s20 + $0x58] sm:$0xff] %vm1175_vm0, %v951_v62  ;;  %v1534_v62 = vld [vmem:[%s3786_s8 + $0x38] sm:$0xff]  ;;  %v1533_v0 = vld [vmem:[%s3786_s8 + $0x30] sm:$0xff] }
 0x123   : > { %v2564_v5 = vpop.f32.mrf.mxu0  ;;  %2681 = vmatpush3.msra.mxu1 %v1538_v57  ;;  %v3426_v57 = vld [vmem:[%s3784_s6] ss:$0 sm:$0xff] }
 0x124   : > { %v952_v6 = vmax.f32 %v936_v3, 0.0  ;;  %2884 = vrcp.f32 %v968_v4  ;;  %v3260_v7 = vadd.f32 %v2564_v5, %v2563_v2  ;;  %2682 = vmatprep.subr.mxu1 %v1537_v59  ;;  %v1532_v2 = vld [vmem:[%s3786_s8 + $0x28] sm:$0xff]  ;;  %v1531_v4 = vld [vmem:[%s3786_s8 + $0x20] sm:$0xff] }
 0x125   : > { %v2879_v9 = vpop.eup %2878  ;;  %v2566_v10 = vpop.f32.mrf.mxu0  ;;  %2683 = vmatpush3.msra.mxu1 %v1537_v59 }
 0x126   : > { %v937_v11 = vadd.f32 %v3260_v7, %v3148_v40  ;;  %v969_v12 = vmax.f32 %v3260_v7, 1e-12  ;;  %1022 = vrot.lane.b32.xlu1 %v2879_v9, %s2950_s16  ;;  %2674 = vmatprep.mubr.msk.f32.mxu1 %vm1175_vm0, %v952_v6  ;;  %1996 = vst.msk [vmem:[%s3116_s20 + $0x60] sm:$0xff] %vm1175_vm0, %v952_v6  ;;  %v1530_v6 = vld [vmem:[%s3786_s8 + $0x18] sm:$0xff] }
 0x127   : > { %v2567_v13 = vpop.f32.mrf.mxu0  ;;  %2684 = vmatprep.subr.mxu1 %v1536_v60 }
 0x128   : > { %v953_v14 = vmax.f32 %v937_v11, 0.0  ;;  %2886 = vrcp.f32 %v969_v12  ;;  %v3269_v16 = vadd.f32 %v2567_v13, %v2566_v10  ;;  %2685 = vmatpush3.msra.mxu1 %v1536_v60  ;;  %v1529_v10 = vld [vmem:[%s3786_s8 + $0x10] sm:$0xff]  ;;  %v1527_v13 = vld [vmem:[%s3786_s8] sm:$0xff] }
 0x129   : > { %v2881_v17 = vpop.eup %2880  ;;  %v2569_v18 = vpop.f32.mrf.mxu0  ;;  %2686 = vmatprep.subr.mxu1 %v1535_v61 }
 0x12a   : > { %v938_v19 = vadd.f32 %v3269_v16, %v3148_v40  ;;  %v970_v20 = vmax.f32 %v3269_v16, 1e-12  ;;  %2675 = vmatmul.mubr.msk.f32.gmra.mxu1 %vm1175_vm0, %v953_v14  ;;  %1024 = vrot.lane.b32.xlu0 %v2881_v17, %s2950_s16  ;;  %1997 = vst.msk [vmem:[%s3116_s20 + $0x68] sm:$0xff] %vm1175_vm0, %v953_v14 }
 0x12b   : > { %v2570_v21 = vpop.f32.mrf.mxu0  ;;  %2687 = vmatpush3.msra.mxu1 %v1535_v61 }
 0x12c   : > { %v954_v23 = vmax.f32 %v938_v19, 0.0  ;;  %2888 = vrcp.f32 %v970_v20  ;;  %v3278_v24 = vadd.f32 %v2570_v21, %v2569_v18  ;;  %2688 = vmatprep.subr.mxu1 %v1534_v62 }
 0x12d   : > { %v2883_v25 = vpop.eup %2882  ;;  %2689 = vmatpush3.msra.mxu1 %v1534_v62 }
 0x12e   : > { %v939_v26 = vadd.f32 %v3278_v24, %v3148_v40  ;;  %1026 = vrot.lane.b32.xlu1 %v2883_v25, %s2950_s16  ;;  %2677 = vmatprep.mubr.msk.f32.mxu1 %vm1175_vm0, %v954_v23  ;;  %1998 = vst.msk [vmem:[%s3116_s20 + $0x70] sm:$0xff] %vm1175_vm0, %v954_v23  ;;  %v971_v32 = vmax.f32 %v3278_v24, 1e-12 }
 0x12f   : > { %2690 = vmatprep.subr.mxu1 %v1533_v0 }
 0x130   : > { %v955_v27 = vmax.f32 %v939_v26, 0.0  ;;  %2890 = vrcp.f32 %v971_v32  ;;  %2691 = vmatpush3.msra.mxu1 %v1533_v0 }
 0x131   : > { %v2885_v28 = vpop.eup %2884  ;;  %2692 = vmatprep.subr.mxu1 %v1532_v2 }
 0x132   : > { %2678 = vmatmul.mubr.msk.f32.gmra.mxu1 %vm1175_vm0, %v955_v27  ;;  %1028 = vrot.lane.b32.xlu0 %v2885_v28, %s2950_s16  ;;  %1999 = vst.msk [vmem:[%s3116_s20 + $0x78] sm:$0xff] %vm1175_vm0, %v955_v27 }
 0x133   : > { %2693 = vmatpush3.msra.mxu1 %v1532_v2  ;;  %v3434_v2 = vld [vmem:[%s3785_s7] ss:$0 sm:$0xff] }
 0x134   : > { %2694 = vmatprep.subr.mxu1 %v1531_v4 }
 0x135   : > { %v2887_v40 = vpop.eup %2886  ;;  %2695 = vmatpush3.msra.mxu1 %v1531_v4 }
 0x136   : > { %1030 = vrot.lane.b32.xlu1 %v2887_v40, %s2950_s16  ;;  %2696 = vmatprep.subr.mxu1 %v1530_v6 }
 0x137   : > { %2697 = vmatpush3.msra.mxu1 %v1530_v6 }
 0x138   : > { %2698 = vmatprep.subr.mxu1 %v1529_v10 }
 0x139   : > { %v2889_v31 = vpop.eup %2888  ;;  %2699 = vmatpush3.msra.mxu1 %v1529_v10 }
 0x13a   : > { %1080 = vperm.xlu1 %2815, %v902_v30   ;;  %1032 = vrot.lane.b32.xlu0 %v2889_v31, %s2950_s16 }
 0x13d   : > { %v2891_v45 = vpop.eup %2890 }
 0x13e   : > { %1085 = vperm.xlu1 %2815, %v903_v33   ;;  %1075 = vperm.xlu0 %2814, %v901_v34   ;;  %v916_v33 = vld [vmem:[%s3294_s18 + $0x78] sm:$0xff] }
 0x142   : > { %1090 = vperm.xlu1 %2815, %v904_v35   ;;  %1095 = vperm.xlu0 %2814, %v905_v38  }
 0x146   : > { %1100 = vperm.xlu1 %2815, %v906_v39   ;;  %1115 = vperm.xlu0 %2814, %v909_v42  }
 0x14a   : > { %1105 = vperm.xlu1 %2815, %v907_v43   ;;  %1135 = vperm.xlu0 %2814, %v913_v44   ;;  %v1767_v43 = vld [vmem:[%s3788_s10 + $0x58] sm:$0xff] }
 0x14e   : > { %1034 = vrot.lane.b32.xlu1 %v2891_v45, %s2950_s16  ;;  %2817 = vset.pattern.permute.xlu0 %v2951_v48 }
 0x152   : > { %1110 = vperm.xlu1 %2815, %v908_v49  }
 0x156   : > { %1120 = vperm.xlu1 %2815, %v910_v50   ;;  %v3416_v50 = vld [vmem:[%s3783_s5] ss:$0 sm:$0xff] }
 0x15a   : > { %1125 = vperm.xlu1 %2815, %v911_v51  }
 0x15e   : > { %1130 = vperm.xlu1 %2815, %v912_v52  }
 0x162   : > { %1140 = vperm.xlu1 %2815, %v914_v54  }
 0x166   : > { %1145 = vperm.xlu1 %2815, %v915_v56  }
 0x16a   : > { %2816 = vset.pattern.permute.xlu1 %v2951_v48 }
 0x174   : > { %v1005_v3 = vpop.permute.xlu0 %1004 }
 0x175   : > { %v1052_v5 = vmul.f32 %v3150_v41, %v1005_v3  ;;  %v1528_v41 = vld [vmem:[%s3786_s8 + $0x8] sm:$0xff] }
 0x176   : > { %2700 = vmatprep.subr.mxu1 %v1528_v41 }
 0x177   : > { %1372 = vperm.xlu1 %2816, %v1052_v5   ;;  %2701 = vmatpush3.msra.mxu1 %v1528_v41 }
 0x178   : > { %v1007_v9 = vpop.permute.xlu0 %1006  ;;  %2702 = vmatprep.subr.mxu1 %v1527_v13 }
 0x179   : > { %v3349_v11 = vmul.f32 %v3155_v47, %v1007_v9  ;;  %2703 = vmatpush3.msra.mxu1 %v1527_v13 }
 0x17a   : > { %2728 = vmatprep.subr.mxu1 %v1767_v43 }
 0x17b   : > { %1377 = vperm.xlu0 %2817, %v3349_v11  }
 0x17c   : > { %v1009_v12 = vpop.permute.xlu1 %1008 }
 0x17d   : > { %v1054_v14 = vmul.f32 %v3163_v53, %v1009_v12 }
 0x17f   : > { %1382 = vperm.xlu0 %2817, %v1054_v14  }
 0x180   : > { %v1011_v47 = vpop.permute.xlu1 %1010 }
 0x181   : > { %v1055_v17 = vmul.f32 %v3171_v58, %v1011_v47 }
 0x183   : > { %1387 = vperm.xlu1 %2816, %v1055_v17  }
 0x184   : > { %v1013_v18 = vpop.permute.xlu0 %1012 }
 0x185   : > { %v1056_v19 = vmul.f32 %v3179_v1, %v1013_v18 }
 0x187   : > { %1392 = vperm.xlu1 %2816, %v1056_v19  }
 0x188   : > { %v1015_v20 = vpop.permute.xlu1 %1014 }
 0x189   : > { %v1057_v21 = vmul.f32 %v3188_v8, %v1015_v20 }
 0x18b   : > { %1397 = vperm.xlu0 %2817, %v1057_v21  }
 0x18c   : > { %v1017_v23 = vpop.permute.xlu0 %1016 }
 0x18d   : > { %v1058_v25 = vmul.f32 %v3197_v15, %v1017_v23 }
 0x18f   : > { %1402 = vperm.xlu0 %2817, %v1058_v25  }
 0x190   : > { %v1019_v53 = vpop.permute.xlu1 %1018 }
 0x191   : > { %v1059_v26 = vmul.f32 %v3206_v22, %v1019_v53  ;;  %v1766_v53 = vld [vmem:[%s3788_s10 + $0x50] sm:$0xff] }
 0x193   : > { %1407 = vperm.xlu1 %2816, %v1059_v26  }
 0x194   : > { %v1021_v27 = vpop.permute.xlu0 %1020 }
 0x195   : > { %v1060_v58 = vmul.f32 %v3215_v29, %v1021_v27 }
 0x197   : > { %1412 = vperm.xlu1 %2816, %v1060_v58  }
 0x198   : > { %v1023_v28 = vpop.permute.xlu1 %1022 }
 0x199   : > { %v1061_v1 = vmul.f32 %v3224_v36, %v1023_v28 }
 0x19b   : > { %1417 = vperm.xlu0 %2817, %v1061_v1  }
 0x19c   : > { %v1025_v40 = vpop.permute.xlu0 %1024 }
 0x19d   : > { %v1062_v8 = vmul.f32 %v3233_v46, %v1025_v40  ;;  %v1765_v40 = vld [vmem:[%s3788_s10 + $0x48] sm:$0xff] }
 0x19f   : > { %1422 = vperm.xlu0 %2817, %v1062_v8  }
 0x1a0   : > { %v1027_v30 = vpop.permute.xlu1 %1026 }
 0x1a1   : > { %v1063_v15 = vmul.f32 %v3242_v55, %v1027_v30 }
 0x1a3   : > { %1427 = vperm.xlu1 %2816, %v1063_v15  }
 0x1a4   : > { %v1029_v31 = vpop.permute.xlu0 %1028 }
 0x1a5   : > { %v1064_v22 = vmul.f32 %v3251_v63, %v1029_v31  ;;  %v1764_v31 = vld [vmem:[%s3788_s10 + $0x40] sm:$0xff] }
 0x1a7   : > { %1432 = vperm.xlu1 %2816, %v1064_v22  }
 0x1a8   : > { %v1031_v32 = vpop.permute.xlu1 %1030 }
 0x1a9   : > { %v1065_v29 = vmul.f32 %v3260_v7, %v1031_v32 }
 0x1ab   : > { %1437 = vperm.xlu0 %2817, %v1065_v29   ;;  %2818 = vset.pattern.permute.xlu1 %v2949_v37 }
 0x1ac   : > { %1150 = vperm.xlu1 %2818, %v916_v33   ;;  %v1033_v36 = vpop.permute.xlu0 %1032 }
 0x1ad   : > { %v3373_v46 = vmul.f32 %v3269_v16, %v1033_v36  ;;  %v1763_v36 = vld [vmem:[%s3788_s10 + $0x38] sm:$0xff] }
 0x1af   : > { %1442 = vperm.xlu0 %2817, %v3373_v46  }
 0x1b0   : > { %2819 = vset.pattern.permute.xlu1 %v2951_v48 }
 0x1b3   : > { %2243 = vrot.lane.b32.xlu0 %v1052_v5, %s2952_s17 }
 0x1b5   : > { %v1081_v55 = vpop.permute.xlu1 %1080 }
 0x1b6   : > { %v1160_v3 = vmul.f32 %v3416_v50, %v1081_v55 }
 0x1b7   : > { %2247 = vrot.lane.b32.xlu0 %v1054_v14, %s2952_s17 }
 0x1b9   : > { %v1086_v63 = vpop.permute.xlu1 %1085  ;;  %v1076_v44 = vpop.permute.xlu0 %1075 }
 0x1ba   : > { %v2658_v49 = vpop.f32.mrf.mxu0  ;;  %v1159_v54 = vmul.f32 %v3416_v50, %v1076_v44  ;;  %v1161_v41 = vmul.f32 %v3416_v50, %v1086_v63 }
 0x1bb   : > { %2251 = vrot.lane.b32.xlu0 %v1056_v19, %s2952_s17  ;;  %v1296_v6 = vadd.f32 %v2658_v49, %v1160_v3 }
 0x1bc   : > { %v1290_v56 = vpop.f32.mrf.mxu0 }
 0x1bd   : > { %v1091_v7 = vpop.permute.xlu1 %1090  ;;  %v1096_v48 = vpop.permute.xlu0 %1095  ;;  %v1291_v61 = vadd.f32 %v1290_v56, %v1159_v54 }
 0x1be   : > { %v1162_v20 = vmul.f32 %v3416_v50, %v1091_v7  ;;  %v1163_v27 = vmul.f32 %v3416_v50, %v1096_v48 }
 0x1bf   : > { %2255 = vrot.lane.b32.xlu0 %v1058_v25, %s2952_s17 }
 0x1c1   : > { %v3381_v37 = vpop.permute.xlu1 %1100  ;;  %v3418_v51 = vpop.permute.xlu0 %1115 }
 0x1c2   : > { %v2661_v0 = vpop.f32.mrf.mxu1  ;;  %v1164_v55 = vmul.f32 %v3416_v50, %v3381_v37  ;;  %v1761_v37 = vld [vmem:[%s3788_s10 + $0x28] sm:$0xff] }
 0x1c3   : > { %2259 = vrot.lane.b32.xlu0 %v1060_v58, %s2952_s17 }
 0x1c5   : > { %v3384_v16 = vpop.permute.xlu1 %1105  ;;  %v3428_v59 = vpop.permute.xlu0 %1135 }
 0x1c6   : > { %v1165_v56 = vmul.f32 %v3416_v50, %v3384_v16 }
 0x1c7   : > { %2263 = vrot.lane.b32.xlu0 %v1062_v8, %s2952_s17 }
 0x1c9   : > { %v1035_v34 = vpop.permute.xlu1 %1034 }
 0x1ca   : > { %v3388_v35 = vmul.f32 %v3278_v24, %v1035_v34 }
 0x1cb   : > { %2267 = vrot.lane.b32.xlu0 %v1064_v22, %s2952_s17 }
 0x1cc   : > { %1447 = vperm.xlu1 %2819, %v3388_v35  }
 0x1cd   : > { %v3392_v38 = vpop.permute.xlu1 %1110 }
 0x1ce   : > { %v1166_v16 = vmul.f32 %v3416_v50, %v3392_v38 }
 0x1d0   : > { %2245 = vrot.lane.b32.xlu1 %v3349_v11, %s2952_s17  ;;  %v1300_v11 = vpop.f32.mrf.mxu1 }
 0x1d1   : > { %v3397_v39 = vpop.permute.xlu1 %1120  ;;  %v1301_v47 = vadd.f32 %v1300_v11, %v1161_v41 }
 0x1d2   : > { %v2664_v19 = vpop.f32.mrf.mxu1 }
 0x1d3   : > { %v1316_v44 = vadd.f32 %v2664_v19, %v1164_v55 }
 0x1d4   : > { %2249 = vrot.lane.b32.xlu1 %v1055_v17, %s2952_s17 }
 0x1d5   : > { %v3400_v42 = vpop.permute.xlu1 %1125 }
 0x1d8   : > { %2253 = vrot.lane.b32.xlu1 %v1057_v21, %s2952_s17 }
 0x1d9   : > { %v3404_v24 = vpop.permute.xlu1 %1130 }
 0x1dc   : > { %2257 = vrot.lane.b32.xlu1 %v1059_v26, %s2952_s17  ;;  %v1306_v26 = vadd.f32 %v2661_v0, %v1162_v20  ;;  %v1760_v0 = vld [vmem:[%s3788_s10 + $0x20] sm:$0xff] }
 0x1dd   : > { %v3410_v45 = vpop.permute.xlu1 %1140 }
 0x1e0   : > { %2261 = vrot.lane.b32.xlu1 %v1061_v1, %s2952_s17  ;;  %v1310_v1 = vpop.f32.mrf.mxu1 }
 0x1e1   : > { %v3420_v52 = vpop.permute.xlu1 %1145  ;;  %v1311_v22 = vadd.f32 %v1310_v1, %v1163_v27 }
 0x1e2   : > { %v2667_v33 = vpop.f32.mrf.mxu1 }
 0x1e3   : > { %v1326_v41 = vadd.f32 %v2667_v33, %v1166_v16 }
 0x1e4   : > { %2265 = vrot.lane.b32.xlu1 %v1063_v15, %s2952_s17  ;;  %v1320_v54 = vpop.f32.mrf.mxu1 }
 0x1e5   : > { %v1321_v3 = vadd.f32 %v1320_v54, %v1165_v56 }
 0x1e8   : > { %2269 = vrot.lane.b32.xlu1 %v1065_v29, %s2952_s17 }
 0x1f2   : > { %v1373_v60 = vpop.permute.xlu1 %1372 }
 0x1f3   : > { %v1456_v62 = vmul.f32 %v3426_v57, %v1373_v60 }
 0x1f5   : > { %v1472_v4 = vadd.f32 %v1456_v62, %v1291_v61 }
 0x1f6   : > { %v1378_v5 = vpop.permute.xlu0 %1377 }
 0x1f7   : > { %v1495_v9 = vadd.f32 %v3434_v2, %v1472_v4  ;;  %v1457_v10 = vmul.f32 %v3426_v57, %v1378_v5 }
 0x1f9   : > { %v1511_v12 = vmax.f32 %v1495_v9, 0.0  ;;  %v1473_v13 = vadd.f32 %v1457_v10, %v1296_v6  ;;  %v2670_v6 = vpop.f32.mrf.mxu1 }
 0x1fa   : > { %v1383_v14 = vpop.permute.xlu0 %1382 }
 0x1fb   : > { %v1496_v17 = vadd.f32 %v3434_v2, %v1473_v13  ;;  %v1458_v18 = vmul.f32 %v3426_v57, %v1383_v14  ;;  %2704 = vmatprep.mubr.msk.f32.mxu1 %vm1546_vm1, %v1511_v12  ;;  %v1167_v12 = vmul.f32 %v3416_v50, %v3418_v51  ;;  %v1168_v51 = vmul.f32 %v3416_v50, %v3397_v39 }
 0x1fd   : > { %v1512_v21 = vmax.f32 %v1496_v17, 0.0  ;;  %v1474_v23 = vadd.f32 %v1458_v18, %v1301_v47  ;;  %v1330_v47 = vpop.f32.mrf.mxu1  ;;  %v1336_v27 = vadd.f32 %v2670_v6, %v1168_v51  ;;  %v1173_v6 = vmul.f32 %v3416_v50, %v3420_v52  ;;  %v1759_v52 = vld [vmem:[%s3788_s10 + $0x18] sm:$0xff] }
 0x1fe   : > { %v1388_v25 = vpop.permute.xlu1 %1387  ;;  %v1331_v38 = vadd.f32 %v1330_v47, %v1167_v12 }
 0x1ff   : > { %v1497_v58 = vadd.f32 %v3434_v2, %v1474_v23  ;;  %v1459_v28 = vmul.f32 %v3426_v57, %v1388_v25  ;;  %2705 = vmatmul.mubr.msk.f32.vlgmr.msra.gmra.mxu1 %vm1546_vm1, %v1512_v21  ;;  %v2673_v23 = vpop.f32.mrf.mxu1 }
 0x200   : > { %2729 = vmatpush3.msra.mxu1 %v1767_v43  ;;  %v1762_v43 = vld [vmem:[%s3788_s10 + $0x30] sm:$0xff] }
 0x201   : > { %v1513_v8 = vmax.f32 %v1497_v58, 0.0  ;;  %v1475_v30 = vadd.f32 %v1459_v28, %v1306_v26  ;;  %2730 = vmatprep.subr.mxu1 %v1766_v53  ;;  %v1340_v1 = vpop.f32.mrf.mxu1 }
 0x202   : > { %v1393_v15 = vpop.permute.xlu1 %1392  ;;  %2731 = vmatpush3.msra.mxu1 %v1766_v53 }
 0x203   : > { %v1498_v32 = vadd.f32 %v3434_v2, %v1475_v30  ;;  %v1460_v29 = vmul.f32 %v3426_v57, %v1393_v15  ;;  %2707 = vmatprep.mubr.msk.f32.mxu1 %vm1546_vm1, %v1513_v8  ;;  %2732 = vmatprep.subr.mxu1 %v1765_v40 }
 0x204   : > { %2733 = vmatpush3.msra.mxu1 %v1765_v40  ;;  %v1169_v40 = vmul.f32 %v3416_v50, %v3400_v42  ;;  %v1171_v42 = vmul.f32 %v3416_v50, %v3428_v59  ;;  %v1172_v59 = vmul.f32 %v3416_v50, %v3410_v45 }
 0x205   : > { %v1514_v63 = vmax.f32 %v1498_v32, 0.0  ;;  %v1476_v7 = vadd.f32 %v1460_v29, %v1311_v22  ;;  %2734 = vmatprep.subr.mxu1 %v1764_v31  ;;  %v2676_v32 = vpop.f32.mrf.mxu1  ;;  %v1170_v29 = vmul.f32 %v3416_v50, %v3404_v24 }
 0x206   : > { %v1398_v34 = vpop.permute.xlu0 %1397  ;;  %2735 = vmatpush3.msra.mxu1 %v1764_v31  ;;  %v1341_v31 = vadd.f32 %v1340_v1, %v1169_v40 }
 0x207   : > { %v1499_v48 = vadd.f32 %v3434_v2, %v1476_v7  ;;  %v1461_v49 = vmul.f32 %v3426_v57, %v1398_v34  ;;  %2708 = vmatmul.mubr.msk.f32.gmra.mxu1 %vm1546_vm1, %v1514_v63  ;;  %2736 = vmatprep.subr.mxu1 %v1763_v36  ;;  %v1346_v63 = vadd.f32 %v2673_v23, %v1170_v29 }
 0x208   : > { %2737 = vmatpush3.msra.mxu1 %v1763_v36 }
 0x209   : > { %v1515_v60 = vmax.f32 %v1499_v48, 0.0  ;;  %v1477_v61 = vadd.f32 %v1461_v49, %v1316_v44  ;;  %2738 = vmatprep.subr.mxu1 %v1762_v43 }
 0x20a   : > { %v1403_v62 = vpop.permute.xlu0 %1402  ;;  %2739 = vmatpush3.msra.mxu1 %v1762_v43  ;;  %v1350_v43 = vpop.f32.mrf.mxu1 }
 0x20b   : > { %v1500_v4 = vadd.f32 %v3434_v2, %v1477_v61  ;;  %v1462_v5 = vmul.f32 %v3426_v57, %v1403_v62  ;;  %2710 = vmatprep.mubr.msk.f32.mxu1 %vm1546_vm1, %v1515_v60  ;;  %2740 = vmatprep.subr.mxu1 %v1761_v37  ;;  %v1351_v54 = vadd.f32 %v1350_v43, %v1171_v42 }
 0x20c   : > { %2741 = vmatpush3.msra.mxu1 %v1761_v37  ;;  %v2679_v56 = vpop.f32.mrf.mxu1 }
 0x20d   : > { %v1516_v9 = vmax.f32 %v1500_v4, 0.0  ;;  %v1478_v10 = vadd.f32 %v1462_v5, %v1321_v3  ;;  %2742 = vmatprep.subr.mxu1 %v1760_v0 }
 0x20e   : > { %v1408_v11 = vpop.permute.xlu1 %1407  ;;  %2743 = vmatpush3.msra.mxu1 %v1760_v0  ;;  %v1356_v0 = vadd.f32 %v2676_v32, %v1172_v59  ;;  %v1360_v5 = vpop.f32.mrf.mxu1 }
 0x20f   : > { %v1501_v13 = vadd.f32 %v3434_v2, %v1478_v10  ;;  %v1463_v14 = vmul.f32 %v3426_v57, %v1408_v11  ;;  %2711 = vmatmul.mubr.msk.f32.gmra.mxu1 %vm1546_vm1, %v1516_v9  ;;  %v1361_v11 = vadd.f32 %v1360_v5, %v1173_v6  ;;  %2744 = vmatprep.subr.mxu1 %v1759_v52 }
 0x210   : > { %2745 = vmatpush3.msra.mxu1 %v1759_v52 }
 0x211   : > { %v1517_v17 = vmax.f32 %v1501_v13, 0.0  ;;  %v1479_v18 = vadd.f32 %v1463_v14, %v1326_v41 }
 0x212   : > { %v1413_v19 = vpop.permute.xlu1 %1412 }
 0x213   : > { %v1502_v20 = vadd.f32 %v3434_v2, %v1479_v18  ;;  %v1464_v21 = vmul.f32 %v3426_v57, %v1413_v19  ;;  %2713 = vmatprep.mubr.msk.f32.mxu1 %vm1546_vm1, %v1517_v17  ;;  %v1758_v17 = vld [vmem:[%s3788_s10 + $0x10] sm:$0xff]  ;;  %v1757_v19 = vld [vmem:[%s3788_s10 + $0x8] sm:$0xff] }
 0x214   : > { %2746 = vmatprep.subr.mxu1 %v1758_v17 }
 0x215   : > { %v1518_v25 = vmax.f32 %v1502_v20, 0.0  ;;  %v1480_v53 = vadd.f32 %v1464_v21, %v1331_v38  ;;  %2747 = vmatpush3.msra.mxu1 %v1758_v17  ;;  %v1756_v20 = vld [vmem:[%s3788_s10] sm:$0xff] }
 0x216   : > { %v1418_v26 = vpop.permute.xlu0 %1417  ;;  %2748 = vmatprep.subr.mxu1 %v1757_v19 }
 0x217   : > { %v1503_v58 = vadd.f32 %v3434_v2, %v1480_v53  ;;  %v1465_v28 = vmul.f32 %v3426_v57, %v1418_v26  ;;  %2714 = vmatmul.mubr.msk.f32.gmra.mxu1 %vm1546_vm1, %v1518_v25 }
 0x218   : > { %2749 = vmatpush3.msra.mxu1 %v1757_v19 }
 0x219   : > { %v1519_v8 = vmax.f32 %v1503_v58, 0.0  ;;  %v1481_v30 = vadd.f32 %v1465_v28, %v1336_v27  ;;  %2750 = vmatprep.subr.mxu1 %v1756_v20 }
 0x21a   : > { %v1423_v15 = vpop.permute.xlu0 %1422  ;;  %2751 = vmatpush3.msra.mxu1 %v1756_v20 }
 0x21b   : > { %v1504_v39 = vadd.f32 %v3434_v2, %v1481_v30  ;;  %v1466_v22 = vmul.f32 %v3426_v57, %v1423_v15  ;;  %2716 = vmatprep.mubr.msk.f32.mxu1 %vm1546_vm1, %v1519_v8 }
 0x21d   : > { %v1520_v33 = vmax.f32 %v1504_v39, 0.0  ;;  %v1482_v36 = vadd.f32 %v1466_v22, %v1341_v31 }
 0x21e   : > { %v1428_v55 = vpop.permute.xlu1 %1427 }
 0x21f   : > { %v1505_v7 = vadd.f32 %v3434_v2, %v1482_v36  ;;  %v1467_v34 = vmul.f32 %v3426_v57, %v1428_v55  ;;  %2717 = vmatmul.mubr.msk.f32.gmra.mxu1 %vm1546_vm1, %v1520_v33 }
 0x221   : > { %v1521_v44 = vmax.f32 %v1505_v7, 0.0  ;;  %v1483_v48 = vadd.f32 %v1467_v34, %v1346_v63 }
 0x222   : > { %v1433_v49 = vpop.permute.xlu1 %1432 }
 0x223   : > { %v1506_v24 = vadd.f32 %v3434_v2, %v1483_v48  ;;  %v1468_v37 = vmul.f32 %v3426_v57, %v1433_v49  ;;  %2719 = vmatprep.mubr.msk.f32.mxu1 %vm1546_vm1, %v1521_v44 }
 0x225   : > { %v1522_v60 = vmax.f32 %v1506_v24, 0.0  ;;  %v1484_v61 = vadd.f32 %v1468_v37, %v1351_v54 }
 0x226   : > { %v1438_v62 = vpop.permute.xlu0 %1437 }
 0x227   : > { %v1507_v3 = vadd.f32 %v3434_v2, %v1484_v61  ;;  %v1469_v4 = vmul.f32 %v3426_v57, %v1438_v62  ;;  %2720 = vmatmul.mubr.msk.f32.gmra.mxu1 %vm1546_vm1, %v1522_v60  ;;  %v1151_v18 = vpop.permute.xlu1 %1150 }
 0x228   : > { %v1174_v38 = vmul.f32 %v3416_v50, %v1151_v18  ;;  %v2471_v50 = vld [vmem:[%s3787_s9] ss:$0 sm:$0xff] }
 0x229   : > { %v1523_v16 = vmax.f32 %v1507_v3, 0.0  ;;  %v1485_v9 = vadd.f32 %v1469_v4, %v1356_v0 }
 0x22a   : > { %v1443_v10 = vpop.permute.xlu0 %1442  ;;  %v1366_v23 = vadd.f32 %v2679_v56, %v1174_v38 }
 0x22b   : > { %v1508_v45 = vadd.f32 %v3434_v2, %v1485_v9  ;;  %v1470_v41 = vmul.f32 %v3426_v57, %v1443_v10  ;;  %2722 = vmatprep.mubr.msk.f32.mxu1 %vm1546_vm1, %v1523_v16 }
 0x22d   : > { %v1524_v12 = vmax.f32 %v1508_v45, 0.0  ;;  %v1486_v13 = vadd.f32 %v1470_v41, %v1361_v11 }
 0x22f   : > { %v1509_v14 = vadd.f32 %v3434_v2, %v1486_v13  ;;  %2723 = vmatmul.mubr.msk.f32.gmra.mxu1 %vm1546_vm1, %v1524_v12 }
 0x231   : > { %v1525_v47 = vmax.f32 %v1509_v14, 0.0 }
 0x233   : > { %2725 = vmatprep.mubr.msk.f32.mxu1 %vm1546_vm1, %v1525_v47  ;;  %v3563_v47 = vld [vmem:[%s3789_s11] ss:$0 sm:$0xff] }
 0x247   : > { %v1448_v21 = vpop.permute.xlu1 %1447 }
 0x248   : > { %v1471_v51 = vmul.f32 %v3426_v57, %v1448_v21 }
 0x24a   : > { %v1487_v25 = vadd.f32 %v1471_v51, %v1366_v23 }
 0x24c   : > { %v1510_v53 = vadd.f32 %v3434_v2, %v1487_v25 }
 0x24e   : > { %v1526_v26 = vmax.f32 %v1510_v53, 0.0 }
 0x250   : > { %2726 = vmatmul.mubr.msk.f32.gmra.mxu1 %vm1546_vm1, %v1526_v26 }
 0x2bf   : > { %v2706_v27 = vpop.f32.mrf.mxu1 }
 0x2c0   : > { %v1667_v58 = vadd.f32 %v2706_v27, %v2471_v50 }
 0x2c1   : > { %v1661_v28 = vpop.f32.mrf.mxu1 }
 0x2c2   : > { %v1662_v1 = vadd.f32 %v2471_v50, %v1661_v28  ;;  %v1741_v8 = vmax.f32 %v1667_v58, 0.0 }
 0x2c4   : > { %v1740_v40 = vmax.f32 %v1662_v1, 0.0 }
 0x2c6   : > { %2752 = vmatprep.mubr.msk.f32.mxu1 %vm1546_vm1, %v1740_v40 }
 0x2c7   : > { %v2709_v30 = vpop.f32.mrf.mxu1  ;;  %2753 = vmatmul.mubr.msk.f32.vlgmr.msra.gmra.mxu1 %vm1546_vm1, %v1741_v8 }
 0x2c8   : > { %v1677_v57 = vadd.f32 %v2709_v30, %v2471_v50 }
 0x2c9   : > { %v1671_v2 = vpop.f32.mrf.mxu1 }
 0x2ca   : > { %v1672_v15 = vadd.f32 %v2471_v50, %v1671_v2  ;;  %v1743_v39 = vmax.f32 %v1677_v57, 0.0 }
 0x2cc   : > { %v1742_v31 = vmax.f32 %v1672_v15, 0.0 }
 0x2ce   : > { %2755 = vmatprep.mubr.msk.f32.mxu1 %vm1546_vm1, %v1742_v31 }
 0x2cf   : > { %v2712_v22 = vpop.f32.mrf.mxu1  ;;  %2756 = vmatmul.mubr.msk.f32.gmra.mxu1 %vm1546_vm1, %v1743_v39 }
 0x2d0   : > { %v1687_v32 = vadd.f32 %v2712_v22, %v2471_v50 }
 0x2d1   : > { %v1681_v29 = vpop.f32.mrf.mxu1 }
 0x2d2   : > { %v1682_v33 = vadd.f32 %v2471_v50, %v1681_v29  ;;  %v1745_v55 = vmax.f32 %v1687_v32, 0.0 }
 0x2d4   : > { %v1744_v36 = vmax.f32 %v1682_v33, 0.0 }
 0x2d6   : > { %2758 = vmatprep.mubr.msk.f32.mxu1 %vm1546_vm1, %v1744_v36 }
 0x2d7   : > { %v2715_v63 = vpop.f32.mrf.mxu1  ;;  %2759 = vmatmul.mubr.msk.f32.gmra.mxu1 %vm1546_vm1, %v1745_v55 }
 0x2d8   : > { %v1697_v42 = vadd.f32 %v2715_v63, %v2471_v50 }
 0x2d9   : > { %v1691_v7 = vpop.f32.mrf.mxu1 }
 0x2da   : > { %v1692_v34 = vadd.f32 %v2471_v50, %v1691_v7  ;;  %v1747_v44 = vmax.f32 %v1697_v42, 0.0 }
 0x2dc   : > { %v1746_v43 = vmax.f32 %v1692_v34, 0.0 }
 0x2de   : > { %2761 = vmatprep.mubr.msk.f32.mxu1 %vm1546_vm1, %v1746_v43 }
 0x2df   : > { %v2718_v48 = vpop.f32.mrf.mxu1  ;;  %2762 = vmatmul.mubr.msk.f32.gmra.mxu1 %vm1546_vm1, %v1747_v44 }
 0x2e0   : > { %v1707_v49 = vadd.f32 %v2718_v48, %v2471_v50 }
 0x2e1   : > { %v1701_v54 = vpop.f32.mrf.mxu1 }
 0x2e2   : > { %v1702_v24 = vadd.f32 %v2471_v50, %v1701_v54  ;;  %v1749_v56 = vmax.f32 %v1707_v49, 0.0 }
 0x2e4   : > { %v1748_v37 = vmax.f32 %v1702_v24, 0.0 }
 0x2e6   : > { %2764 = vmatprep.mubr.msk.f32.mxu1 %vm1546_vm1, %v1748_v37 }
 0x2e7   : > { %v2721_v59 = vpop.f32.mrf.mxu1  ;;  %2765 = vmatmul.mubr.msk.f32.gmra.mxu1 %vm1546_vm1, %v1749_v56 }
 0x2e8   : > { %v1717_v60 = vadd.f32 %v2721_v59, %v2471_v50 }
 0x2e9   : > { %v1711_v61 = vpop.f32.mrf.mxu1 }
 0x2ea   : > { %v1712_v62 = vadd.f32 %v2471_v50, %v1711_v61  ;;  %v1751_v3 = vmax.f32 %v1717_v60, 0.0 }
 0x2ec   : > { %v1750_v0 = vmax.f32 %v1712_v62, 0.0 }
 0x2ee   : > { %2767 = vmatprep.mubr.msk.f32.mxu1 %vm1546_vm1, %v1750_v0 }
 0x2ef   : > { %v2724_v4 = vpop.f32.mrf.mxu1  ;;  %2768 = vmatmul.mubr.msk.f32.gmra.mxu1 %vm1546_vm1, %v1751_v3 }
 0x2f0   : > { %v1727_v5 = vadd.f32 %v2724_v4, %v2471_v50 }
 0x2f1   : > { %v1721_v6 = vpop.f32.mrf.mxu1 }
 0x2f2   : > { %v1722_v16 = vadd.f32 %v2471_v50, %v1721_v6  ;;  %v1753_v10 = vmax.f32 %v1727_v5, 0.0 }
 0x2f4   : > { %v1752_v9 = vmax.f32 %v1722_v16, 0.0 }
 0x2f6   : > { %2770 = vmatprep.mubr.msk.f32.mxu1 %vm1546_vm1, %v1752_v9 }
 0x2f7   : > { %2771 = vmatmul.mubr.msk.f32.gmra.mxu1 %vm1546_vm1, %v1753_v10 }
 0x310   : > { %v2727_v11 = vpop.f32.mrf.mxu1 }
 0x311   : > { %v1737_v45 = vadd.f32 %v2727_v11, %v2471_v50 }
 0x312   : > { %v1731_v41 = vpop.f32.mrf.mxu1 }
 0x313   : > { %v1732_v12 = vadd.f32 %v2471_v50, %v1731_v41  ;;  %v1755_v14 = vmax.f32 %v1737_v45, 0.0 }
 0x315   : > { %v1754_v13 = vmax.f32 %v1732_v12, 0.0 }
 0x317   : > { %2773 = vmatprep.mubr.msk.f32.mxu1 %vm1546_vm1, %v1754_v13 }
 0x318   : > { %2774 = vmatmul.mubr.msk.f32.gmra.mxu1 %vm1546_vm1, %v1755_v14 }
 0x387   : > { %v2754_v52 = vpop.f32.mrf.mxu1 }
 0x388   : > { %v1895_v17 = vadd.f32 %v2754_v52, %v3563_v47 }
 0x389   : > { %v1889_v18 = vpop.f32.mrf.mxu1 }
 0x38a   : > { %v2001_v19 = vmul.f32 0.5, %v1895_v17  ;;  %v1890_v38 = vadd.f32 %v3563_v47, %v1889_v18  ;;  %2180 = vrot.lane.b32.xlu1 %v1895_v17, %s2953_s29 }
 0x38c   : > { %2892 = vtanh.f32 %v2001_v19  ;;  %v2000_v20 = vmul.f32 0.5, %v1890_v38  ;;  %2178 = vrot.lane.b32.xlu0 %v1890_v38, %s2953_s29 }
 0x38e   : > { %2894 = vtanh.f32 %v2000_v20 }
 0x38f   : > { %v2757_v21 = vpop.f32.mrf.mxu1 }
 0x390   : > { %v1905_v23 = vadd.f32 %v2757_v21, %v3563_v47 }
 0x391   : > { %v1899_v51 = vpop.f32.mrf.mxu1 }
 0x392   : > { %v2003_v25 = vmul.f32 0.5, %v1905_v23  ;;  %v1900_v53 = vadd.f32 %v3563_v47, %v1899_v51  ;;  %2184 = vrot.lane.b32.xlu1 %v1905_v23, %s2953_s29 }
 0x394   : > { %2896 = vtanh.f32 %v2003_v25  ;;  %v2002_v26 = vmul.f32 0.5, %v1900_v53  ;;  %2182 = vrot.lane.b32.xlu0 %v1900_v53, %s2953_s29 }
 0x396   : > { %2898 = vtanh.f32 %v2002_v26 }
 0x397   : > { %v2760_v50 = vpop.f32.mrf.mxu1 }
 0x398   : > { %v1915_v27 = vadd.f32 %v2760_v50, %v3563_v47 }
 0x399   : > { %v2893_v58 = vpop.eup %2892  ;;  %v1909_v28 = vpop.f32.mrf.mxu1 }
 0x39a   : > { %v2005_v1 = vmul.f32 0.5, %v1915_v27  ;;  %v1910_v40 = vadd.f32 %v3563_v47, %v1909_v28  ;;  %2188 = vrot.lane.b32.xlu1 %v1915_v27, %s2953_s29  ;;  %v2033_v8 = vadd.f32 1.0, %v2893_v58 }
 0x39b   : > { %v2895_v30 = vpop.eup %2894 }
 0x39c   : > { %2900 = vtanh.f32 %v2005_v1  ;;  %v2004_v57 = vmul.f32 0.5, %v1910_v40  ;;  %2186 = vrot.lane.b32.xlu0 %v1910_v40, %s2953_s29  ;;  %v2049_v2 = vmul.f32 0.5, %v2033_v8  ;;  %v2032_v15 = vadd.f32 1.0, %v2895_v30 }
 0x39e   : > { %2902 = vtanh.f32 %v2004_v57  ;;  %2082 = vrot.lane.b32.xlu1 %v2049_v2, %s2953_s29  ;;  %v2048_v31 = vmul.f32 0.5, %v2032_v15  ;;  %v2246_v15 = vpop.permute.xlu1 %2245 }
 0x39f   : > { %v2763_v39 = vpop.f32.mrf.mxu1 }
 0x3a0   : > { %v1925_v22 = vadd.f32 %v2763_v39, %v3563_v47  ;;  %2080 = vrot.lane.b32.xlu0 %v2048_v31, %s2953_s29 }
 0x3a1   : > { %v2897_v32 = vpop.eup %2896  ;;  %v1919_v29 = vpop.f32.mrf.mxu1 }
 0x3a2   : > { %v2007_v33 = vmul.f32 0.5, %v1925_v22  ;;  %v1920_v36 = vadd.f32 %v3563_v47, %v1919_v29  ;;  %2192 = vrot.lane.b32.xlu1 %v1925_v22, %s2953_s29  ;;  %v2035_v55 = vadd.f32 1.0, %v2897_v32  ;;  %v2244_v32 = vpop.permute.xlu0 %2243 }
 0x3a3   : > { %v2899_v63 = vpop.eup %2898 }
 0x3a4   : > { %2904 = vtanh.f32 %v2007_v33  ;;  %v2006_v42 = vmul.f32 0.5, %v1920_v36  ;;  %2190 = vrot.lane.b32.xlu0 %v1920_v36, %s2953_s29  ;;  %v2051_v7 = vmul.f32 0.5, %v2035_v55  ;;  %v2034_v34 = vadd.f32 1.0, %v2899_v63 }
 0x3a6   : > { %2906 = vtanh.f32 %v2006_v42  ;;  %2086 = vrot.lane.b32.xlu1 %v2051_v7, %s2953_s29  ;;  %v2050_v43 = vmul.f32 0.5, %v2034_v34  ;;  %v2248_v63 = vpop.permute.xlu0 %2247 }
 0x3a7   : > { %v2766_v44 = vpop.f32.mrf.mxu1 }
 0x3a8   : > { %v1935_v48 = vadd.f32 %v2766_v44, %v3563_v47  ;;  %2084 = vrot.lane.b32.xlu0 %v2050_v43, %s2953_s29 }
 0x3a9   : > { %v2901_v49 = vpop.eup %2900  ;;  %v1929_v54 = vpop.f32.mrf.mxu1 }
 0x3aa   : > { %v2009_v24 = vmul.f32 0.5, %v1935_v48  ;;  %v1930_v37 = vadd.f32 %v3563_v47, %v1929_v54  ;;  %2196 = vrot.lane.b32.xlu1 %v1935_v48, %s2953_s29  ;;  %v2037_v56 = vadd.f32 1.0, %v2901_v49  ;;  %v2252_v34 = vpop.permute.xlu0 %2251 }
 0x3ab   : > { %v2903_v59 = vpop.eup %2902 }
 0x3ac   : > { %2908 = vtanh.f32 %v2009_v24  ;;  %v2008_v60 = vmul.f32 0.5, %v1930_v37  ;;  %2194 = vrot.lane.b32.xlu0 %v1930_v37, %s2953_s29  ;;  %v2053_v61 = vmul.f32 0.5, %v2037_v56  ;;  %v2036_v62 = vadd.f32 1.0, %v2903_v59 }
 0x3ae   : > { %2910 = vtanh.f32 %v2008_v60  ;;  %2090 = vrot.lane.b32.xlu1 %v2053_v61, %s2953_s29  ;;  %v2052_v0 = vmul.f32 0.5, %v2036_v62  ;;  %v3614_v37 = vpop.permute.xlu0 %2255 }
 0x3af   : > { %v2769_v3 = vpop.f32.mrf.mxu1 }
 0x3b0   : > { %v1945_v4 = vadd.f32 %v2769_v3, %v3563_v47  ;;  %2088 = vrot.lane.b32.xlu0 %v2052_v0, %s2953_s29 }
 0x3b1   : > { %v2905_v5 = vpop.eup %2904  ;;  %v1939_v6 = vpop.f32.mrf.mxu1 }
 0x3b2   : > { %v1940_v16 = vadd.f32 %v3563_v47, %v1939_v6  ;;  %2200 = vrot.lane.b32.xlu1 %v1945_v4, %s2953_s29  ;;  %v2039_v9 = vadd.f32 1.0, %v2905_v5  ;;  %v2011_v23 = vmul.f32 0.5, %v1945_v4  ;;  %v3623_v59 = vpop.permute.xlu0 %2259 }
 0x3b3   : > { %v2907_v10 = vpop.eup %2906 }
 0x3b4   : > { %2198 = vrot.lane.b32.xlu0 %v1940_v16, %s2953_s29  ;;  %v2055_v11 = vmul.f32 0.5, %v2039_v9  ;;  %v2038_v45 = vadd.f32 1.0, %v2907_v10  ;;  %v2010_v51 = vmul.f32 0.5, %v1940_v16  ;;  %2912 = vtanh.f32 %v2011_v23 }
 0x3b6   : > { %2094 = vrot.lane.b32.xlu1 %v2055_v11, %s2953_s29  ;;  %v2054_v41 = vmul.f32 0.5, %v2038_v45  ;;  %2914 = vtanh.f32 %v2010_v51  ;;  %v3627_v61 = vpop.permute.xlu0 %2263 }
 0x3b7   : > { %v2772_v12 = vpop.f32.mrf.mxu1 }
 0x3b8   : > { %v1955_v13 = vadd.f32 %v2772_v12, %v3563_v47  ;;  %2092 = vrot.lane.b32.xlu0 %v2054_v41, %s2953_s29 }
 0x3b9   : > { %v2909_v14 = vpop.eup %2908  ;;  %v1949_v52 = vpop.f32.mrf.mxu1 }
 0x3ba   : > { %v1950_v17 = vadd.f32 %v3563_v47, %v1949_v52  ;;  %2204 = vrot.lane.b32.xlu1 %v1955_v13, %s2953_s29  ;;  %v2041_v18 = vadd.f32 1.0, %v2909_v14  ;;  %v2013_v25 = vmul.f32 0.5, %v1955_v13  ;;  %v3631_v0 = vpop.permute.xlu0 %2267 }
 0x3bb   : > { %v2911_v19 = vpop.eup %2910 }
 0x3bc   : > { %2202 = vrot.lane.b32.xlu0 %v1950_v17, %s2953_s29  ;;  %v2057_v38 = vmul.f32 0.5, %v2041_v18  ;;  %v2040_v20 = vadd.f32 1.0, %v2911_v19  ;;  %v2012_v53 = vmul.f32 0.5, %v1950_v17  ;;  %2916 = vtanh.f32 %v2013_v25 }
 0x3be   : > { %2098 = vrot.lane.b32.xlu1 %v2057_v38, %s2953_s29  ;;  %v2056_v21 = vmul.f32 0.5, %v2040_v20  ;;  %2918 = vtanh.f32 %v2012_v53 }
 0x3c0   : > { %2096 = vrot.lane.b32.xlu0 %v2056_v21, %s2953_s29 }
 0x3c1   : > { %v2913_v26 = vpop.eup %2912 }
 0x3c2   : > { %v2043_v28 = vadd.f32 1.0, %v2913_v26 }
 0x3c3   : > { %v2915_v50 = vpop.eup %2914 }
 0x3c4   : > { %v2042_v57 = vadd.f32 1.0, %v2915_v50  ;;  %v2059_v22 = vmul.f32 0.5, %v2043_v28 }
 0x3c6   : > { %v2058_v29 = vmul.f32 0.5, %v2042_v57 }
 0x3c9   : > { %v2917_v1 = vpop.eup %2916 }
 0x3ca   : > { %v2045_v31 = vadd.f32 1.0, %v2917_v1 }
 0x3cb   : > { %v2919_v2 = vpop.eup %2918 }
 0x3cc   : > { %v2044_v33 = vadd.f32 1.0, %v2919_v2  ;;  %v2061_v36 = vmul.f32 0.5, %v2045_v31 }
 0x3ce   : > { %v2060_v55 = vmul.f32 0.5, %v2044_v33 }
 0x3d8   : > { %v2775_v27 = vpop.f32.mrf.mxu1 }
 0x3d9   : > { %v1965_v58 = vadd.f32 %v2775_v27, %v3563_v47 }
 0x3da   : > { %v1959_v40 = vpop.f32.mrf.mxu1 }
 0x3db   : > { %v2015_v8 = vmul.f32 0.5, %v1965_v58  ;;  %v1960_v30 = vadd.f32 %v3563_v47, %v1959_v40  ;;  %2208 = vrot.lane.b32.xlu1 %v1965_v58, %s2953_s29  ;;  %v2250_v47 = vpop.permute.xlu1 %2249 }
 0x3dd   : > { %2920 = vtanh.f32 %v2015_v8  ;;  %v2014_v39 = vmul.f32 0.5, %v1960_v30  ;;  %2206 = vrot.lane.b32.xlu0 %v1960_v30, %s2953_s29 }
 0x3df   : > { %2922 = vtanh.f32 %v2014_v39  ;;  %2102 = vrot.lane.b32.xlu1 %v2059_v22, %s2953_s29  ;;  %v2254_v42 = vpop.permute.xlu1 %2253 }
 0x3e1   : > { %2100 = vrot.lane.b32.xlu0 %v2058_v29, %s2953_s29 }
 0x3e3   : > { %2106 = vrot.lane.b32.xlu1 %v2061_v36, %s2953_s29  ;;  %v3611_v54 = vpop.permute.xlu1 %2257 }
 0x3e5   : > { %2104 = vrot.lane.b32.xlu0 %v2060_v55, %s2953_s29 }
 0x3e7   : > { %v3619_v56 = vpop.permute.xlu1 %2261 }
 0x3ea   : > { %v2921_v7 = vpop.eup %2920 }
 0x3eb   : > { %v2047_v43 = vadd.f32 1.0, %v2921_v7  ;;  %v3625_v60 = vpop.permute.xlu1 %2265 }
 0x3ec   : > { %v2923_v44 = vpop.eup %2922 }
 0x3ed   : > { %v2063_v48 = vmul.f32 0.5, %v2047_v43  ;;  %v2046_v49 = vadd.f32 1.0, %v2923_v44 }
 0x3ef   : > { %2110 = vrot.lane.b32.xlu1 %v2063_v48, %s2953_s29  ;;  %v2062_v24 = vmul.f32 0.5, %v2046_v49  ;;  %v3629_v62 = vpop.permute.xlu1 %2269 }
 0x3f1   : > { %2108 = vrot.lane.b32.xlu0 %v2062_v24, %s2953_s29 }
 0x3f3   : > { %2273 = vrot.lane.b32.xlu1 %v3388_v35, %s2952_s17 }
 0x3f5   : > { %2271 = vrot.lane.b32.xlu0 %v3373_v46, %s2952_s17 }
 0x3fc   : > { %v2181_v35 = vpop.permute.xlu1 %2180 }
 0x3fe   : > { %v2179_v3 = vpop.permute.xlu0 %2178 }
 0x404   : > { %v2185_v4 = vpop.permute.xlu1 %2184 }
 0x406   : > { %v2183_v46 = vpop.permute.xlu0 %2182 }
 0x40c   : > { %v2189_v5 = vpop.permute.xlu1 %2188 }
 0x40e   : > { %v2187_v6 = vpop.permute.xlu0 %2186 }
 0x410   : > { %v2083_v16 = vpop.permute.xlu1 %2082 }
 0x411   : > { %2130 = vst.msk [vmem:[%s3116_s20 + $0x8] sm:$0xff] %vm2128_vm2, %v2083_v16 }
 0x412   : > { %2147 = vst.msk [vmem:[%s3116_s20 + $0x8] sm:$0xff] %vm2145_vm3, %v2083_v16  ;;  %v2081_v9 = vpop.permute.xlu0 %2080 }
 0x413   : > { %2228 = vst.msk [vmem:[%s3116_s20 + $0x8] sm:$0xff] %vm2226_vm4, %v2181_v35 }
 0x414   : > { %2129 = vst.msk [vmem:[%s3116_s20] sm:$0xff] %vm2128_vm2, %v2081_v9  ;;  %v2193_v10 = vpop.permute.xlu1 %2192 }
 0x415   : > { %2293 = vst.msk [vmem:[%s3116_s20 + $0x8] sm:$0xff] %vm2291_vm5, %v2246_v15 }
 0x416   : > { %2146 = vst.msk [vmem:[%s3116_s20] sm:$0xff] %vm2145_vm3, %v2081_v9  ;;  %v2191_v11 = vpop.permute.xlu0 %2190 }
 0x417   : > { %2227 = vst.msk [vmem:[%s3116_s20] sm:$0xff] %vm2226_vm4, %v2179_v3 }
 0x418   : > { %2292 = vst.msk [vmem:[%s3116_s20] sm:$0xff] %vm2291_vm5, %v2244_v32  ;;  %v2087_v45 = vpop.permute.xlu1 %2086 }
 0x419   : > { %2132 = vst.msk [vmem:[%s3116_s20 + $0x18] sm:$0xff] %vm2128_vm2, %v2087_v45 }
 0x41a   : > { %2149 = vst.msk [vmem:[%s3116_s20 + $0x18] sm:$0xff] %vm2145_vm3, %v2087_v45  ;;  %v2085_v41 = vpop.permute.xlu0 %2084 }
 0x41b   : > { %2230 = vst.msk [vmem:[%s3116_s20 + $0x18] sm:$0xff] %vm2226_vm4, %v2185_v4 }
 0x41c   : > { %2131 = vst.msk [vmem:[%s3116_s20 + $0x10] sm:$0xff] %vm2128_vm2, %v2085_v41  ;;  %v2197_v12 = vpop.permute.xlu1 %2196 }
 0x41d   : > { %2295 = vst.msk [vmem:[%s3116_s20 + $0x18] sm:$0xff] %vm2291_vm5, %v2250_v47 }
 0x41e   : > { %2148 = vst.msk [vmem:[%s3116_s20 + $0x10] sm:$0xff] %vm2145_vm3, %v2085_v41  ;;  %v2195_v13 = vpop.permute.xlu0 %2194 }
 0x41f   : > { %2229 = vst.msk [vmem:[%s3116_s20 + $0x10] sm:$0xff] %vm2226_vm4, %v2183_v46 }
 0x420   : > { %2294 = vst.msk [vmem:[%s3116_s20 + $0x10] sm:$0xff] %vm2291_vm5, %v2248_v63  ;;  %v2091_v14 = vpop.permute.xlu1 %2090 }
 0x421   : > { %2134 = vst.msk [vmem:[%s3116_s20 + $0x28] sm:$0xff] %vm2128_vm2, %v2091_v14 }
 0x422   : > { %2151 = vst.msk [vmem:[%s3116_s20 + $0x28] sm:$0xff] %vm2145_vm3, %v2091_v14  ;;  %v2089_v52 = vpop.permute.xlu0 %2088 }
 0x423   : > { %2232 = vst.msk [vmem:[%s3116_s20 + $0x28] sm:$0xff] %vm2226_vm4, %v2189_v5 }
 0x424   : > { %2133 = vst.msk [vmem:[%s3116_s20 + $0x20] sm:$0xff] %vm2128_vm2, %v2089_v52  ;;  %v2201_v17 = vpop.permute.xlu1 %2200 }
 0x425   : > { %2297 = vst.msk [vmem:[%s3116_s20 + $0x28] sm:$0xff] %vm2291_vm5, %v2254_v42 }
 0x426   : > { %2150 = vst.msk [vmem:[%s3116_s20 + $0x20] sm:$0xff] %vm2145_vm3, %v2089_v52  ;;  %v2199_v18 = vpop.permute.xlu0 %2198 }
 0x427   : > { %2231 = vst.msk [vmem:[%s3116_s20 + $0x20] sm:$0xff] %vm2226_vm4, %v2187_v6 }
 0x428   : > { %2296 = vst.msk [vmem:[%s3116_s20 + $0x20] sm:$0xff] %vm2291_vm5, %v2252_v34  ;;  %v2095_v19 = vpop.permute.xlu1 %2094 }
 0x429   : > { %2136 = vst.msk [vmem:[%s3116_s20 + $0x38] sm:$0xff] %vm2128_vm2, %v2095_v19 }
 0x42a   : > { %2153 = vst.msk [vmem:[%s3116_s20 + $0x38] sm:$0xff] %vm2145_vm3, %v2095_v19  ;;  %v2093_v38 = vpop.permute.xlu0 %2092 }
 0x42b   : > { %2234 = vst.msk [vmem:[%s3116_s20 + $0x38] sm:$0xff] %vm2226_vm4, %v2193_v10 }
 0x42c   : > { %2135 = vst.msk [vmem:[%s3116_s20 + $0x30] sm:$0xff] %vm2128_vm2, %v2093_v38  ;;  %v2205_v20 = vpop.permute.xlu1 %2204 }
 0x42d   : > { %2299 = vst.msk [vmem:[%s3116_s20 + $0x38] sm:$0xff] %vm2291_vm5, %v3611_v54 }
 0x42e   : > { %2152 = vst.msk [vmem:[%s3116_s20 + $0x30] sm:$0xff] %vm2145_vm3, %v2093_v38  ;;  %v2203_v21 = vpop.permute.xlu0 %2202 }
 0x42f   : > { %2233 = vst.msk [vmem:[%s3116_s20 + $0x30] sm:$0xff] %vm2226_vm4, %v2191_v11 }
 0x430   : > { %2298 = vst.msk [vmem:[%s3116_s20 + $0x30] sm:$0xff] %vm2291_vm5, %v3614_v37  ;;  %v2099_v23 = vpop.permute.xlu1 %2098 }
 0x431   : > { %2138 = vst.msk [vmem:[%s3116_s20 + $0x48] sm:$0xff] %vm2128_vm2, %v2099_v23 }
 0x432   : > { %2155 = vst.msk [vmem:[%s3116_s20 + $0x48] sm:$0xff] %vm2145_vm3, %v2099_v23  ;;  %v2097_v51 = vpop.permute.xlu0 %2096 }
 0x433   : > { %2236 = vst.msk [vmem:[%s3116_s20 + $0x48] sm:$0xff] %vm2226_vm4, %v2197_v12 }
 0x434   : > { %2137 = vst.msk [vmem:[%s3116_s20 + $0x40] sm:$0xff] %vm2128_vm2, %v2097_v51 }
 0x435   : > { %2301 = vst.msk [vmem:[%s3116_s20 + $0x48] sm:$0xff] %vm2291_vm5, %v3619_v56 }
 0x436   : > { %2154 = vst.msk [vmem:[%s3116_s20 + $0x40] sm:$0xff] %vm2145_vm3, %v2097_v51 }
 0x437   : > { %2235 = vst.msk [vmem:[%s3116_s20 + $0x40] sm:$0xff] %vm2226_vm4, %v2195_v13 }
 0x438   : > { %2300 = vst.msk [vmem:[%s3116_s20 + $0x40] sm:$0xff] %vm2291_vm5, %v3623_v59 }
 0x44d   : > { %v2209_v25 = vpop.permute.xlu1 %2208 }
 0x44f   : > { %v2207_v53 = vpop.permute.xlu0 %2206 }
 0x451   : > { %v2103_v26 = vpop.permute.xlu1 %2102 }
 0x452   : > { %2140 = vst.msk [vmem:[%s3116_s20 + $0x58] sm:$0xff] %vm2128_vm2, %v2103_v26 }
 0x453   : > { %2157 = vst.msk [vmem:[%s3116_s20 + $0x58] sm:$0xff] %vm2145_vm3, %v2103_v26  ;;  %v2101_v50 = vpop.permute.xlu0 %2100 }
 0x454   : > { %2238 = vst.msk [vmem:[%s3116_s20 + $0x58] sm:$0xff] %vm2226_vm4, %v2201_v17 }
 0x455   : > { %2139 = vst.msk [vmem:[%s3116_s20 + $0x50] sm:$0xff] %vm2128_vm2, %v2101_v50  ;;  %v2107_v27 = vpop.permute.xlu1 %2106 }
 0x456   : > { %2303 = vst.msk [vmem:[%s3116_s20 + $0x58] sm:$0xff] %vm2291_vm5, %v3625_v60 }
 0x457   : > { %2156 = vst.msk [vmem:[%s3116_s20 + $0x50] sm:$0xff] %vm2145_vm3, %v2101_v50  ;;  %v2105_v58 = vpop.permute.xlu0 %2104 }
 0x458   : > { %2237 = vst.msk [vmem:[%s3116_s20 + $0x50] sm:$0xff] %vm2226_vm4, %v2199_v18 }
 0x459   : > { %2142 = vst.msk [vmem:[%s3116_s20 + $0x68] sm:$0xff] %vm2128_vm2, %v2107_v27  ;;  %2141 = vst.msk [vmem:[%s3116_s20 + $0x60] sm:$0xff] %vm2128_vm2, %v2105_v58 }
 0x45a   : > { %2302 = vst.msk [vmem:[%s3116_s20 + $0x50] sm:$0xff] %vm2291_vm5, %v3627_v61 }
 0x45b   : > { %2159 = vst.msk [vmem:[%s3116_s20 + $0x68] sm:$0xff] %vm2145_vm3, %v2107_v27  ;;  %2158 = vst.msk [vmem:[%s3116_s20 + $0x60] sm:$0xff] %vm2145_vm3, %v2105_v58 }
 0x45c   : > { %2240 = vst.msk [vmem:[%s3116_s20 + $0x68] sm:$0xff] %vm2226_vm4, %v2205_v20  ;;  %2239 = vst.msk [vmem:[%s3116_s20 + $0x60] sm:$0xff] %vm2226_vm4, %v2203_v21 }
 0x45d   : > { %2305 = vst.msk [vmem:[%s3116_s20 + $0x68] sm:$0xff] %vm2291_vm5, %v3629_v62  ;;  %2304 = vst.msk [vmem:[%s3116_s20 + $0x60] sm:$0xff] %vm2291_vm5, %v3631_v0 }
 0x461   : > { %v2111_v28 = vpop.permute.xlu1 %2110 }
 0x462   : > { %2144 = vst.msk [vmem:[%s3116_s20 + $0x78] sm:$0xff] %vm2128_vm2, %v2111_v28 }
 0x463   : > { %2161 = vst.msk [vmem:[%s3116_s20 + $0x78] sm:$0xff] %vm2145_vm3, %v2111_v28  ;;  %v2109_v1 = vpop.permute.xlu0 %2108 }
 0x464   : > { %2242 = vst.msk [vmem:[%s3116_s20 + $0x78] sm:$0xff] %vm2226_vm4, %v2209_v25 }
 0x465   : > { %2143 = vst.msk [vmem:[%s3116_s20 + $0x70] sm:$0xff] %vm2128_vm2, %v2109_v1  ;;  %v2274_v40 = vpop.permute.xlu1 %2273 }
 0x466   : > { %2160 = vst.msk [vmem:[%s3116_s20 + $0x70] sm:$0xff] %vm2145_vm3, %v2109_v1 }
 0x467   : > { %2241 = vst.msk [vmem:[%s3116_s20 + $0x70] sm:$0xff] %vm2226_vm4, %v2207_v53  ;;  %v2272_v8 = vpop.permute.xlu0 %2271 }
 0x468   : > { %2307 = vst.msk [vmem:[%s3116_s20 + $0x78] sm:$0xff] %vm2291_vm5, %v2274_v40  ;;  %2306 = vst.msk [vmem:[%s3116_s20 + $0x70] sm:$0xff] %vm2291_vm5, %v2272_v8 }
 0x469 PF: > { %s22_s23 = sadd.s32 1, %s2946_s23   ;;  %s3791_s21 = smov %s2942_s22 }
 0x46a   : > { %p19_p5 = scmp.ge.s32.totalorder %s22_s23, 4   ;;  %s3792_s22 = smov %s3794_s24 }
 0x46c   :  { %21 = sbr.rel (!%p19_p5) target bundleno = 2 (0x2), region = 112 }

</bundles_post_ra>
